<compile_context>
chip_gen: v6e
topology: v6e:2x2x1
jax: 0.10.0
libtpu: 0.0.40
codegen_flags: <defaults>
</compile_context>

<pallas_src>
import math

import jax
import jax.numpy as jnp
from jax.experimental import pallas as pl
from jax.experimental.pallas import tpu as pltpu

# ---- model hyper-parameters (small, consistent with the forward pass) ----
B = 2            # batch
S = 8            # sequence length
D = 32           # hidden dim
H = 4            # attention heads
HD = D // H      # head dim
FF = 4 * D       # MLP hidden dim (= 128, lane-dense)
NUM_BLOCKS = 2
EPS = 1e-5


def encoder_kernel(x_ref, vec_ref, wattn_ref, w1_ref, w2_ref, out_ref):
    """One grid step = the full NUM_BLOCKS-deep encoder applied to one batch element (S, D).

    vec_ref   : (8, 128)  rows = [ln1_g, ln1_b, ln2_g, ln2_b, b_qkv(96), b_o, b1, b2]
    wattn_ref : (D, 4D)   columns = [Wq*scale | Wk | Wv | Wo]
    w1_ref    : (D, FF),  w2_ref : (FF, D)
    """

    def layer_norm(t, g, b):
        mu = jnp.mean(t, axis=-1, keepdims=True)
        var = jnp.mean((t - mu) ** 2, axis=-1, keepdims=True)
        return (t - mu) * jax.lax.rsqrt(var + EPS) * g + b

    def block(x):                                       # x: (S, D) f32
        # ---------- LN1 + multi-head self-attention (fused QKV / fused out-proj) ----------
        xn = layer_norm(x, vec_ref[0:1, :D], vec_ref[1:2, :D])
        # one (S,D)@(D,3D) MXU push; softmax scale and q/k/v biases pre-folded
        qkv = (jnp.dot(xn, wattn_ref[:, :3 * D],
                       preferred_element_type=jnp.float32)
               + vec_ref[4:5, :3 * D])                  # (S, 3D)
        # heads gathered onto a leading batch axis (leading-axis stack of static lane slices)
        q = jnp.stack([qkv[:, h * HD:(h + 1) * HD] for h in range(H)], axis=0)
        k = jnp.stack([qkv[:, D + h * HD:D + (h + 1) * HD] for h in range(H)], axis=0)
        v = jnp.stack([qkv[:, 2 * D + h * HD:2 * D + (h + 1) * HD] for h in range(H)], axis=0)
        s = jnp.einsum('hqd,hkd->hqk', q, k,
                       preferred_element_type=jnp.float32)         # (H, S, S)
        s = s - jnp.max(s, axis=-1, keepdims=True)
        p = jnp.exp(s)
        p = p / jnp.sum(p, axis=-1, keepdims=True)                  # exact softmax
        o = jnp.einsum('hqk,hkd->hqd', p, v,
                       preferred_element_type=jnp.float32)          # (H, S, HD)
        o = jnp.concatenate([o[h] for h in range(H)], axis=-1)      # (S, D)
        attn = (jnp.dot(o, wattn_ref[:, 3 * D:],
                        preferred_element_type=jnp.float32)
                + vec_ref[5:6, :D])
        x1 = x + attn                                   # residual 1

        # ---------- LN2 + MLP ----------
        x2n = layer_norm(x1, vec_ref[2:3, :D], vec_ref[3:4, :D])
        h1 = (jnp.dot(x2n, w1_ref[...], preferred_element_type=jnp.float32)
              + vec_ref[6:7, :FF])
        g = 0.5 * h1 * (1.0 + jnp.tanh(0.7978845608028654 *
                                       (h1 + 0.044715 * h1 * h1 * h1)))
        h2 = (jnp.dot(g, w2_ref[...], preferred_element_type=jnp.float32)
              + vec_ref[7:8, :D])
        return x1 + h2                                  # residual 2

    x = x_ref[...]                                      # (S, D): squeezed batch element
    for _ in range(NUM_BLOCKS):                         # shared params -> same block repeated
        x = block(x)
    out_ref[...] = x


def _prep_params(params):
    """Trace-time packing (outside the kernel) into 4 lane-dense slabs."""
    (ln1g, ln1b, wq, bq, wk, bk, wv, bv, wo, bo,
     ln2g, ln2b, w1, b1, w2, b2) = params

    scale = 1.0 / math.sqrt(HD)
    # fused QKV weights (scale folded into q) + output projection -> one (D, 4D) slab
    wattn = jnp.concatenate([wq * scale, wk, wv, wo], axis=1)        # (32, 128)
    bqkv = jnp.concatenate([bq * scale, bk, bv], axis=0)             # (96,)

    def row(v):   # pad each small vector to one lane-dense 128-wide row
        return jnp.pad(v, (0, 128 - v.shape[0])).reshape(1, 128)

    vec_slab = jnp.concatenate(
        [row(ln1g), row(ln1b), row(ln2g), row(ln2b),
         row(bqkv), row(bo), row(b1), row(b2)], axis=0)              # (8, 128)

    return vec_slab, wattn, w1, w2


@jax.jit
def transformer_encoder(tokens, params):
    vec_slab, wattn, w1, w2 = _prep_params(params)

    def wspec(shape):        # whole-slab VMEM resident, constant block index across grid
        return pl.BlockSpec(shape, lambda b: (0, 0))

    return pl.pallas_call(
        encoder_kernel,
        out_shape=jax.ShapeDtypeStruct((B, S, D), jnp.float32),
        grid=(B,),
        in_specs=[
            pl.BlockSpec((None, S, D), lambda b: (b, 0, 0)),   # one batch element per step
            wspec((8, 128)),                                   # LN gains/biases + all biases
            wspec((D, 4 * D)),                                 # [Wq*scale | Wk | Wv | Wo]
            wspec((D, FF)),                                    # W1
            wspec((FF, D)),                                    # W2
        ],
        out_specs=pl.BlockSpec((None, S, D), lambda b: (b, 0, 0)),
        compiler_params=pltpu.CompilerParams(
            dimension_semantics=("parallel",)),                # v7x: one TC per batch element
    )(tokens, vec_slab, wattn, w1, w2)


def encoder_reference(tokens, params):
    """Pure-JAX reference of the same forward pass."""
    (ln1g, ln1b, wq, bq, wk, bk, wv, bv, wo, bo,
     ln2g, ln2b, w1, b1, w2, b2) = params

    def ln(t, g, b):
        mu = jnp.mean(t, -1, keepdims=True)
        var = jnp.mean((t - mu) ** 2, -1, keepdims=True)
        return (t - mu) * jax.lax.rsqrt(var + EPS) * g + b

    x = tokens
    for _ in range(NUM_BLOCKS):
        xn = ln(x, ln1g, ln1b)
        q = (xn @ wq + bq).reshape(B, S, H, HD).transpose(0, 2, 1, 3)
        k = (xn @ wk + bk).reshape(B, S, H, HD).transpose(0, 2, 1, 3)
        v = (xn @ wv + bv).reshape(B, S, H, HD).transpose(0, 2, 1, 3)
        s = (q @ jnp.swapaxes(k, -1, -2)) / math.sqrt(HD)
        p = jax.nn.softmax(s, axis=-1)
        o = (p @ v).transpose(0, 2, 1, 3).reshape(B, S, D)
        x = x + o @ wo + bo
        x2n = ln(x, ln2g, ln2b)
        h1 = x2n @ w1 + b1
        g = 0.5 * h1 * (1.0 + jnp.tanh(0.7978845608028654 *
                                       (h1 + 0.044715 * h1 * h1 * h1)))
        x = x + g @ w2 + b2
    return x


def init_params(key):
    ks = jax.random.split(key, 6)
    std = 0.02

    def w(k, shape):
        return (std * jax.random.normal(k, shape)).astype(jnp.float32)

    ln1g = jnp.ones((D,), jnp.float32); ln1b = jnp.zeros((D,), jnp.float32)
    wq = w(ks[0], (D, D)); bq = jnp.zeros((D,), jnp.float32)
    wk = w(ks[1], (D, D)); bk = jnp.zeros((D,), jnp.float32)
    wv = w(ks[2], (D, D)); bv = jnp.zeros((D,), jnp.float32)
    wo = w(ks[3], (D, D)); bo = jnp.zeros((D,), jnp.float32)
    ln2g = jnp.ones((D,), jnp.float32); ln2b = jnp.zeros((D,), jnp.float32)
    w1 = w(ks[4], (D, FF)); b1 = jnp.zeros((FF,), jnp.float32)
    w2 = w(ks[5], (FF, D)); b2 = jnp.zeros((D,), jnp.float32)
    return (ln1g, ln1b, wq, bq, wk, bk, wv, bv, wo, bo,
            ln2g, ln2b, w1, b1, w2, b2)


if __name__ == "__main__":
    key = jax.random.PRNGKey(0)
    k_tok, k_par = jax.random.split(key)
    tokens = jax.random.normal(k_tok, (B, S, D), dtype=jnp.float32)
    params = init_params(k_par)

    out = jax.block_until_ready(transformer_encoder(tokens, params))

    assert out.shape == (B, S, D)
    assert bool(jnp.all(jnp.isfinite(out)))
    ref = encoder_reference(tokens, params)
    # Exact softmax now -> tight tolerance (residual diff only from MXU f32 rounding).
    assert bool(jnp.allclose(out, ref, atol=1e-3, rtol=1e-3))
    print("KERNEL_OK")
</pallas_src>

<mosaic_0001>
module attributes {stable_mosaic.version = 11 : i64} {
  func.func @encoder_kernel(%arg0: i32, %arg1: memref<1x8x32xf32, #tpu.memory_space<vmem>>, %arg2: memref<8x128xf32, #tpu.memory_space<vmem>>, %arg3: memref<32x128xf32, #tpu.memory_space<vmem>>, %arg4: memref<32x128xf32, #tpu.memory_space<vmem>>, %arg5: memref<128x32xf32, #tpu.memory_space<vmem>>, %arg6: memref<1x8x32xf32, #tpu.memory_space<vmem>>) attributes {dimension_semantics = [#tpu.dimension_semantics<parallel>], iteration_bounds = array<i64: 2>, scalar_prefetch = 0 : i64, scratch_operands = 0 : i64, tpu.core_type = #tpu.core_type<tc>, window_params = [{transform_indices = @transform_0, window_bounds = array<i64: 1, 8, 32>}, {pipeline_mode = #tpu.pipeline_mode<synchronous>, transform_indices = @transform_1, window_bounds = array<i64: 8, 128>}, {pipeline_mode = #tpu.pipeline_mode<synchronous>, transform_indices = @transform_2, window_bounds = array<i64: 32, 128>}, {pipeline_mode = #tpu.pipeline_mode<synchronous>, transform_indices = @transform_3, window_bounds = array<i64: 32, 128>}, {pipeline_mode = #tpu.pipeline_mode<synchronous>, transform_indices = @transform_4, window_bounds = array<i64: 128, 32>}, {transform_indices = @transform_5, window_bounds = array<i64: 1, 8, 32>}]} {
    %c0 = arith.constant 0 : index
    %c0_0 = arith.constant 0 : index
    %c0_1 = arith.constant 0 : index
    %0 = vector.load %arg1[%c0, %c0_0, %c0_1] : memref<1x8x32xf32, #tpu.memory_space<vmem>>, vector<1x8x32xf32>
    %1 = vector.shape_cast %0 : vector<1x8x32xf32> to vector<8x32xf32>
    %c0_2 = arith.constant 0 : index
    %c0_3 = arith.constant 0 : index
    %2 = vector.load %arg2[%c0_2, %c0_3] : memref<8x128xf32, #tpu.memory_space<vmem>>, vector<1x32xf32>
    %c1 = arith.constant 1 : index
    %c0_4 = arith.constant 0 : index
    %3 = vector.load %arg2[%c1, %c0_4] : memref<8x128xf32, #tpu.memory_space<vmem>>, vector<1x32xf32>
    %cst = arith.constant dense<0.000000e+00> : vector<8xf32>
    %4 = vector.multi_reduction <add>, %1, %cst [1] : vector<8x32xf32> to vector<8xf32>
    %5 = vector.shape_cast %4 : vector<8xf32> to vector<8x1xf32>
    %cst_5 = arith.constant 3.200000e+01 : f32
    %6 = vector.broadcast %cst_5 : f32 to vector<8x1xf32>
    %7 = arith.divf %5, %6 : vector<8x1xf32>
    %8 = vector.broadcast %7 : vector<8x1xf32> to vector<8x32xf32>
    %9 = arith.subf %1, %8 : vector<8x32xf32>
    %10 = arith.mulf %9, %9 : vector<8x32xf32>
    %cst_6 = arith.constant dense<0.000000e+00> : vector<8xf32>
    %11 = vector.multi_reduction <add>, %10, %cst_6 [1] : vector<8x32xf32> to vector<8xf32>
    %12 = vector.shape_cast %11 : vector<8xf32> to vector<8x1xf32>
    %cst_7 = arith.constant 3.200000e+01 : f32
    %13 = vector.broadcast %cst_7 : f32 to vector<8x1xf32>
    %14 = arith.divf %12, %13 : vector<8x1xf32>
    %15 = vector.broadcast %7 : vector<8x1xf32> to vector<8x32xf32>
    %16 = arith.subf %1, %15 : vector<8x32xf32>
    %cst_8 = arith.constant 9.99999974E-6 : f32
    %17 = vector.broadcast %cst_8 : f32 to vector<8x1xf32>
    %18 = arith.addf %14, %17 : vector<8x1xf32>
    %19 = math.rsqrt %18 : vector<8x1xf32>
    %20 = vector.broadcast %19 : vector<8x1xf32> to vector<8x32xf32>
    %21 = arith.mulf %16, %20 : vector<8x32xf32>
    %22 = vector.broadcast %2 : vector<1x32xf32> to vector<8x32xf32>
    %23 = arith.mulf %21, %22 : vector<8x32xf32>
    %24 = vector.broadcast %3 : vector<1x32xf32> to vector<8x32xf32>
    %25 = arith.addf %23, %24 : vector<8x32xf32>
    %c0_9 = arith.constant 0 : index
    %c0_10 = arith.constant 0 : index
    %26 = vector.load %arg3[%c0_9, %c0_10] : memref<32x128xf32, #tpu.memory_space<vmem>>, vector<32x96xf32>
    %cst_11 = arith.constant dense<0.000000e+00> : vector<8x96xf32>
    %27 = tpu.matmul %25, %26, %cst_11 {dimension_numbers = #tpu.dot_dimension_numbers<[1], [0], [0], [1], [0, 0, 1, 1], [], []>} : vector<8x32xf32>, vector<32x96xf32>, vector<8x96xf32> -> vector<8x96xf32>
    %c4 = arith.constant 4 : index
    %c0_12 = arith.constant 0 : index
    %28 = vector.load %arg2[%c4, %c0_12] : memref<8x128xf32, #tpu.memory_space<vmem>>, vector<1x96xf32>
    %29 = vector.broadcast %28 : vector<1x96xf32> to vector<8x96xf32>
    %30 = arith.addf %27, %29 : vector<8x96xf32>
    %31 = vector.extract_strided_slice %30 {offsets = [0, 0], sizes = [8, 8], strides = [1, 1]} : vector<8x96xf32> to vector<8x8xf32>
    %32 = vector.extract_strided_slice %30 {offsets = [0, 8], sizes = [8, 8], strides = [1, 1]} : vector<8x96xf32> to vector<8x8xf32>
    %33 = vector.extract_strided_slice %30 {offsets = [0, 16], sizes = [8, 8], strides = [1, 1]} : vector<8x96xf32> to vector<8x8xf32>
    %34 = vector.extract_strided_slice %30 {offsets = [0, 24], sizes = [8, 8], strides = [1, 1]} : vector<8x96xf32> to vector<8x8xf32>
    %35 = vector.shape_cast %31 : vector<8x8xf32> to vector<1x8x8xf32>
    %36 = vector.shape_cast %32 : vector<8x8xf32> to vector<1x8x8xf32>
    %37 = vector.shape_cast %33 : vector<8x8xf32> to vector<1x8x8xf32>
    %38 = vector.shape_cast %34 : vector<8x8xf32> to vector<1x8x8xf32>
    %39 = tpu.concatenate %35, %36, %37, %38 in 0 : vector<1x8x8xf32>, vector<1x8x8xf32>, vector<1x8x8xf32>, vector<1x8x8xf32> -> vector<4x8x8xf32>
    %40 = vector.extract_strided_slice %30 {offsets = [0, 32], sizes = [8, 8], strides = [1, 1]} : vector<8x96xf32> to vector<8x8xf32>
    %41 = vector.extract_strided_slice %30 {offsets = [0, 40], sizes = [8, 8], strides = [1, 1]} : vector<8x96xf32> to vector<8x8xf32>
    %42 = vector.extract_strided_slice %30 {offsets = [0, 48], sizes = [8, 8], strides = [1, 1]} : vector<8x96xf32> to vector<8x8xf32>
    %43 = vector.extract_strided_slice %30 {offsets = [0, 56], sizes = [8, 8], strides = [1, 1]} : vector<8x96xf32> to vector<8x8xf32>
    %44 = vector.shape_cast %40 : vector<8x8xf32> to vector<1x8x8xf32>
    %45 = vector.shape_cast %41 : vector<8x8xf32> to vector<1x8x8xf32>
    %46 = vector.shape_cast %42 : vector<8x8xf32> to vector<1x8x8xf32>
    %47 = vector.shape_cast %43 : vector<8x8xf32> to vector<1x8x8xf32>
    %48 = tpu.concatenate %44, %45, %46, %47 in 0 : vector<1x8x8xf32>, vector<1x8x8xf32>, vector<1x8x8xf32>, vector<1x8x8xf32> -> vector<4x8x8xf32>
    %49 = vector.extract_strided_slice %30 {offsets = [0, 64], sizes = [8, 8], strides = [1, 1]} : vector<8x96xf32> to vector<8x8xf32>
    %50 = vector.extract_strided_slice %30 {offsets = [0, 72], sizes = [8, 8], strides = [1, 1]} : vector<8x96xf32> to vector<8x8xf32>
    %51 = vector.extract_strided_slice %30 {offsets = [0, 80], sizes = [8, 8], strides = [1, 1]} : vector<8x96xf32> to vector<8x8xf32>
    %52 = vector.extract_strided_slice %30 {offsets = [0, 88], sizes = [8, 8], strides = [1, 1]} : vector<8x96xf32> to vector<8x8xf32>
    %53 = vector.shape_cast %49 : vector<8x8xf32> to vector<1x8x8xf32>
    %54 = vector.shape_cast %50 : vector<8x8xf32> to vector<1x8x8xf32>
    %55 = vector.shape_cast %51 : vector<8x8xf32> to vector<1x8x8xf32>
    %56 = vector.shape_cast %52 : vector<8x8xf32> to vector<1x8x8xf32>
    %57 = tpu.concatenate %53, %54, %55, %56 in 0 : vector<1x8x8xf32>, vector<1x8x8xf32>, vector<1x8x8xf32>, vector<1x8x8xf32> -> vector<4x8x8xf32>
    "tpu.trace_start"() <{level = 10 : i32, message = "hqd,hkd->hqk"}> : () -> ()
    %cst_13 = arith.constant dense<0.000000e+00> : vector<4x8x8xf32>
    %58 = tpu.matmul %39, %48, %cst_13 {dimension_numbers = #tpu.dot_dimension_numbers<[2], [2], [1], [1], [0, 0, 0, 1, 1, 1], [0], [0]>} : vector<4x8x8xf32>, vector<4x8x8xf32>, vector<4x8x8xf32> -> vector<4x8x8xf32>
    "tpu.trace_stop"() : () -> ()
    %cst_14 = arith.constant dense<0xFF800000> : vector<4x8xf32>
    %59 = vector.multi_reduction <maximumf>, %58, %cst_14 [2] : vector<4x8x8xf32> to vector<4x8xf32>
    %60 = vector.shape_cast %59 : vector<4x8xf32> to vector<4x8x1xf32>
    %61 = vector.broadcast %60 : vector<4x8x1xf32> to vector<4x8x8xf32>
    %62 = arith.subf %58, %61 : vector<4x8x8xf32>
    %63 = math.exp %62 : vector<4x8x8xf32>
    %cst_15 = arith.constant dense<0.000000e+00> : vector<4x8xf32>
    %64 = vector.multi_reduction <add>, %63, %cst_15 [2] : vector<4x8x8xf32> to vector<4x8xf32>
    %65 = vector.shape_cast %64 : vector<4x8xf32> to vector<4x8x1xf32>
    %66 = vector.broadcast %65 : vector<4x8x1xf32> to vector<4x8x8xf32>
    %67 = arith.divf %63, %66 : vector<4x8x8xf32>
    "tpu.trace_start"() <{level = 10 : i32, message = "hqk,hkd->hqd"}> : () -> ()
    %cst_16 = arith.constant dense<0.000000e+00> : vector<4x8x8xf32>
    %68 = tpu.matmul %67, %57, %cst_16 {dimension_numbers = #tpu.dot_dimension_numbers<[2], [1], [1], [2], [0, 0, 0, 1, 1, 2], [0], [0]>} : vector<4x8x8xf32>, vector<4x8x8xf32>, vector<4x8x8xf32> -> vector<4x8x8xf32>
    "tpu.trace_stop"() : () -> ()
    %69 = vector.extract_strided_slice %68 {offsets = [0, 0, 0], sizes = [1, 8, 8], strides = [1, 1, 1]} : vector<4x8x8xf32> to vector<1x8x8xf32>
    %70 = vector.shape_cast %69 : vector<1x8x8xf32> to vector<8x8xf32>
    %71 = vector.extract_strided_slice %68 {offsets = [1, 0, 0], sizes = [1, 8, 8], strides = [1, 1, 1]} : vector<4x8x8xf32> to vector<1x8x8xf32>
    %72 = vector.shape_cast %71 : vector<1x8x8xf32> to vector<8x8xf32>
    %73 = vector.extract_strided_slice %68 {offsets = [2, 0, 0], sizes = [1, 8, 8], strides = [1, 1, 1]} : vector<4x8x8xf32> to vector<1x8x8xf32>
    %74 = vector.shape_cast %73 : vector<1x8x8xf32> to vector<8x8xf32>
    %75 = vector.extract_strided_slice %68 {offsets = [3, 0, 0], sizes = [1, 8, 8], strides = [1, 1, 1]} : vector<4x8x8xf32> to vector<1x8x8xf32>
    %76 = vector.shape_cast %75 : vector<1x8x8xf32> to vector<8x8xf32>
    %77 = tpu.concatenate %70, %72, %74, %76 in 1 : vector<8x8xf32>, vector<8x8xf32>, vector<8x8xf32>, vector<8x8xf32> -> vector<8x32xf32>
    %c0_17 = arith.constant 0 : index
    %c96 = arith.constant 96 : index
    %78 = vector.load %arg3[%c0_17, %c96] : memref<32x128xf32, #tpu.memory_space<vmem>>, vector<32x32xf32>
    %cst_18 = arith.constant dense<0.000000e+00> : vector<8x32xf32>
    %79 = tpu.matmul %77, %78, %cst_18 {dimension_numbers = #tpu.dot_dimension_numbers<[1], [0], [0], [1], [0, 0, 1, 1], [], []>} : vector<8x32xf32>, vector<32x32xf32>, vector<8x32xf32> -> vector<8x32xf32>
    %c5 = arith.constant 5 : index
    %c0_19 = arith.constant 0 : index
    %80 = vector.load %arg2[%c5, %c0_19] : memref<8x128xf32, #tpu.memory_space<vmem>>, vector<1x32xf32>
    %81 = vector.broadcast %80 : vector<1x32xf32> to vector<8x32xf32>
    %82 = arith.addf %79, %81 : vector<8x32xf32>
    %83 = arith.addf %1, %82 : vector<8x32xf32>
    %c2 = arith.constant 2 : index
    %c0_20 = arith.constant 0 : index
    %84 = vector.load %arg2[%c2, %c0_20] : memref<8x128xf32, #tpu.memory_space<vmem>>, vector<1x32xf32>
    %c3 = arith.constant 3 : index
    %c0_21 = arith.constant 0 : index
    %85 = vector.load %arg2[%c3, %c0_21] : memref<8x128xf32, #tpu.memory_space<vmem>>, vector<1x32xf32>
    %cst_22 = arith.constant dense<0.000000e+00> : vector<8xf32>
    %86 = vector.multi_reduction <add>, %83, %cst_22 [1] : vector<8x32xf32> to vector<8xf32>
    %87 = vector.shape_cast %86 : vector<8xf32> to vector<8x1xf32>
    %cst_23 = arith.constant 3.200000e+01 : f32
    %88 = vector.broadcast %cst_23 : f32 to vector<8x1xf32>
    %89 = arith.divf %87, %88 : vector<8x1xf32>
    %90 = vector.broadcast %89 : vector<8x1xf32> to vector<8x32xf32>
    %91 = arith.subf %83, %90 : vector<8x32xf32>
    %92 = arith.mulf %91, %91 : vector<8x32xf32>
    %cst_24 = arith.constant dense<0.000000e+00> : vector<8xf32>
    %93 = vector.multi_reduction <add>, %92, %cst_24 [1] : vector<8x32xf32> to vector<8xf32>
    %94 = vector.shape_cast %93 : vector<8xf32> to vector<8x1xf32>
    %cst_25 = arith.constant 3.200000e+01 : f32
    %95 = vector.broadcast %cst_25 : f32 to vector<8x1xf32>
    %96 = arith.divf %94, %95 : vector<8x1xf32>
    %97 = vector.broadcast %89 : vector<8x1xf32> to vector<8x32xf32>
    %98 = arith.subf %83, %97 : vector<8x32xf32>
    %cst_26 = arith.constant 9.99999974E-6 : f32
    %99 = vector.broadcast %cst_26 : f32 to vector<8x1xf32>
    %100 = arith.addf %96, %99 : vector<8x1xf32>
    %101 = math.rsqrt %100 : vector<8x1xf32>
    %102 = vector.broadcast %101 : vector<8x1xf32> to vector<8x32xf32>
    %103 = arith.mulf %98, %102 : vector<8x32xf32>
    %104 = vector.broadcast %84 : vector<1x32xf32> to vector<8x32xf32>
    %105 = arith.mulf %103, %104 : vector<8x32xf32>
    %106 = vector.broadcast %85 : vector<1x32xf32> to vector<8x32xf32>
    %107 = arith.addf %105, %106 : vector<8x32xf32>
    %c0_27 = arith.constant 0 : index
    %c0_28 = arith.constant 0 : index
    %108 = vector.load %arg4[%c0_27, %c0_28] : memref<32x128xf32, #tpu.memory_space<vmem>>, vector<32x128xf32>
    %cst_29 = arith.constant dense<0.000000e+00> : vector<8x128xf32>
    %109 = tpu.matmul %107, %108, %cst_29 {dimension_numbers = #tpu.dot_dimension_numbers<[1], [0], [0], [1], [0, 0, 1, 1], [], []>} : vector<8x32xf32>, vector<32x128xf32>, vector<8x128xf32> -> vector<8x128xf32>
    %c6 = arith.constant 6 : index
    %c0_30 = arith.constant 0 : index
    %110 = vector.load %arg2[%c6, %c0_30] : memref<8x128xf32, #tpu.memory_space<vmem>>, vector<1x128xf32>
    %111 = vector.broadcast %110 : vector<1x128xf32> to vector<8x128xf32>
    %112 = arith.addf %109, %111 : vector<8x128xf32>
    %cst_31 = arith.constant 5.000000e-01 : f32
    %113 = vector.broadcast %cst_31 : f32 to vector<8x128xf32>
    %114 = arith.mulf %113, %112 : vector<8x128xf32>
    %cst_32 = arith.constant 4.471500e-02 : f32
    %115 = vector.broadcast %cst_32 : f32 to vector<8x128xf32>
    %116 = arith.mulf %115, %112 : vector<8x128xf32>
    %117 = arith.mulf %116, %112 : vector<8x128xf32>
    %118 = arith.mulf %117, %112 : vector<8x128xf32>
    %119 = arith.addf %112, %118 : vector<8x128xf32>
    %cst_33 = arith.constant 0.797884583 : f32
    %120 = vector.broadcast %cst_33 : f32 to vector<8x128xf32>
    %121 = arith.mulf %120, %119 : vector<8x128xf32>
    %122 = math.tanh %121 : vector<8x128xf32>
    %cst_34 = arith.constant 1.000000e+00 : f32
    %123 = vector.broadcast %cst_34 : f32 to vector<8x128xf32>
    %124 = arith.addf %123, %122 : vector<8x128xf32>
    %125 = arith.mulf %114, %124 : vector<8x128xf32>
    %c0_35 = arith.constant 0 : index
    %c0_36 = arith.constant 0 : index
    %126 = vector.load %arg5[%c0_35, %c0_36] : memref<128x32xf32, #tpu.memory_space<vmem>>, vector<128x32xf32>
    %cst_37 = arith.constant dense<0.000000e+00> : vector<8x32xf32>
    %127 = tpu.matmul %125, %126, %cst_37 {dimension_numbers = #tpu.dot_dimension_numbers<[1], [0], [0], [1], [0, 0, 1, 1], [], []>} : vector<8x128xf32>, vector<128x32xf32>, vector<8x32xf32> -> vector<8x32xf32>
    %c7 = arith.constant 7 : index
    %c0_38 = arith.constant 0 : index
    %128 = vector.load %arg2[%c7, %c0_38] : memref<8x128xf32, #tpu.memory_space<vmem>>, vector<1x32xf32>
    %129 = vector.broadcast %128 : vector<1x32xf32> to vector<8x32xf32>
    %130 = arith.addf %127, %129 : vector<8x32xf32>
    %131 = arith.addf %83, %130 : vector<8x32xf32>
    %c0_39 = arith.constant 0 : index
    %c0_40 = arith.constant 0 : index
    %132 = vector.load %arg2[%c0_39, %c0_40] : memref<8x128xf32, #tpu.memory_space<vmem>>, vector<1x32xf32>
    %c1_41 = arith.constant 1 : index
    %c0_42 = arith.constant 0 : index
    %133 = vector.load %arg2[%c1_41, %c0_42] : memref<8x128xf32, #tpu.memory_space<vmem>>, vector<1x32xf32>
    %cst_43 = arith.constant dense<0.000000e+00> : vector<8xf32>
    %134 = vector.multi_reduction <add>, %131, %cst_43 [1] : vector<8x32xf32> to vector<8xf32>
    %135 = vector.shape_cast %134 : vector<8xf32> to vector<8x1xf32>
    %cst_44 = arith.constant 3.200000e+01 : f32
    %136 = vector.broadcast %cst_44 : f32 to vector<8x1xf32>
    %137 = arith.divf %135, %136 : vector<8x1xf32>
    %138 = vector.broadcast %137 : vector<8x1xf32> to vector<8x32xf32>
    %139 = arith.subf %131, %138 : vector<8x32xf32>
    %140 = arith.mulf %139, %139 : vector<8x32xf32>
    %cst_45 = arith.constant dense<0.000000e+00> : vector<8xf32>
    %141 = vector.multi_reduction <add>, %140, %cst_45 [1] : vector<8x32xf32> to vector<8xf32>
    %142 = vector.shape_cast %141 : vector<8xf32> to vector<8x1xf32>
    %cst_46 = arith.constant 3.200000e+01 : f32
    %143 = vector.broadcast %cst_46 : f32 to vector<8x1xf32>
    %144 = arith.divf %142, %143 : vector<8x1xf32>
    %145 = vector.broadcast %137 : vector<8x1xf32> to vector<8x32xf32>
    %146 = arith.subf %131, %145 : vector<8x32xf32>
    %cst_47 = arith.constant 9.99999974E-6 : f32
    %147 = vector.broadcast %cst_47 : f32 to vector<8x1xf32>
    %148 = arith.addf %144, %147 : vector<8x1xf32>
    %149 = math.rsqrt %148 : vector<8x1xf32>
    %150 = vector.broadcast %149 : vector<8x1xf32> to vector<8x32xf32>
    %151 = arith.mulf %146, %150 : vector<8x32xf32>
    %152 = vector.broadcast %132 : vector<1x32xf32> to vector<8x32xf32>
    %153 = arith.mulf %151, %152 : vector<8x32xf32>
    %154 = vector.broadcast %133 : vector<1x32xf32> to vector<8x32xf32>
    %155 = arith.addf %153, %154 : vector<8x32xf32>
    %c0_48 = arith.constant 0 : index
    %c0_49 = arith.constant 0 : index
    %156 = vector.load %arg3[%c0_48, %c0_49] : memref<32x128xf32, #tpu.memory_space<vmem>>, vector<32x96xf32>
    %cst_50 = arith.constant dense<0.000000e+00> : vector<8x96xf32>
    %157 = tpu.matmul %155, %156, %cst_50 {dimension_numbers = #tpu.dot_dimension_numbers<[1], [0], [0], [1], [0, 0, 1, 1], [], []>} : vector<8x32xf32>, vector<32x96xf32>, vector<8x96xf32> -> vector<8x96xf32>
    %c4_51 = arith.constant 4 : index
    %c0_52 = arith.constant 0 : index
    %158 = vector.load %arg2[%c4_51, %c0_52] : memref<8x128xf32, #tpu.memory_space<vmem>>, vector<1x96xf32>
    %159 = vector.broadcast %158 : vector<1x96xf32> to vector<8x96xf32>
    %160 = arith.addf %157, %159 : vector<8x96xf32>
    %161 = vector.extract_strided_slice %160 {offsets = [0, 0], sizes = [8, 8], strides = [1, 1]} : vector<8x96xf32> to vector<8x8xf32>
    %162 = vector.extract_strided_slice %160 {offsets = [0, 8], sizes = [8, 8], strides = [1, 1]} : vector<8x96xf32> to vector<8x8xf32>
    %163 = vector.extract_strided_slice %160 {offsets = [0, 16], sizes = [8, 8], strides = [1, 1]} : vector<8x96xf32> to vector<8x8xf32>
    %164 = vector.extract_strided_slice %160 {offsets = [0, 24], sizes = [8, 8], strides = [1, 1]} : vector<8x96xf32> to vector<8x8xf32>
    %165 = vector.shape_cast %161 : vector<8x8xf32> to vector<1x8x8xf32>
    %166 = vector.shape_cast %162 : vector<8x8xf32> to vector<1x8x8xf32>
    %167 = vector.shape_cast %163 : vector<8x8xf32> to vector<1x8x8xf32>
    %168 = vector.shape_cast %164 : vector<8x8xf32> to vector<1x8x8xf32>
    %169 = tpu.concatenate %165, %166, %167, %168 in 0 : vector<1x8x8xf32>, vector<1x8x8xf32>, vector<1x8x8xf32>, vector<1x8x8xf32> -> vector<4x8x8xf32>
    %170 = vector.extract_strided_slice %160 {offsets = [0, 32], sizes = [8, 8], strides = [1, 1]} : vector<8x96xf32> to vector<8x8xf32>
    %171 = vector.extract_strided_slice %160 {offsets = [0, 40], sizes = [8, 8], strides = [1, 1]} : vector<8x96xf32> to vector<8x8xf32>
    %172 = vector.extract_strided_slice %160 {offsets = [0, 48], sizes = [8, 8], strides = [1, 1]} : vector<8x96xf32> to vector<8x8xf32>
    %173 = vector.extract_strided_slice %160 {offsets = [0, 56], sizes = [8, 8], strides = [1, 1]} : vector<8x96xf32> to vector<8x8xf32>
    %174 = vector.shape_cast %170 : vector<8x8xf32> to vector<1x8x8xf32>
    %175 = vector.shape_cast %171 : vector<8x8xf32> to vector<1x8x8xf32>
    %176 = vector.shape_cast %172 : vector<8x8xf32> to vector<1x8x8xf32>
    %177 = vector.shape_cast %173 : vector<8x8xf32> to vector<1x8x8xf32>
    %178 = tpu.concatenate %174, %175, %176, %177 in 0 : vector<1x8x8xf32>, vector<1x8x8xf32>, vector<1x8x8xf32>, vector<1x8x8xf32> -> vector<4x8x8xf32>
    %179 = vector.extract_strided_slice %160 {offsets = [0, 64], sizes = [8, 8], strides = [1, 1]} : vector<8x96xf32> to vector<8x8xf32>
    %180 = vector.extract_strided_slice %160 {offsets = [0, 72], sizes = [8, 8], strides = [1, 1]} : vector<8x96xf32> to vector<8x8xf32>
    %181 = vector.extract_strided_slice %160 {offsets = [0, 80], sizes = [8, 8], strides = [1, 1]} : vector<8x96xf32> to vector<8x8xf32>
    %182 = vector.extract_strided_slice %160 {offsets = [0, 88], sizes = [8, 8], strides = [1, 1]} : vector<8x96xf32> to vector<8x8xf32>
    %183 = vector.shape_cast %179 : vector<8x8xf32> to vector<1x8x8xf32>
    %184 = vector.shape_cast %180 : vector<8x8xf32> to vector<1x8x8xf32>
    %185 = vector.shape_cast %181 : vector<8x8xf32> to vector<1x8x8xf32>
    %186 = vector.shape_cast %182 : vector<8x8xf32> to vector<1x8x8xf32>
    %187 = tpu.concatenate %183, %184, %185, %186 in 0 : vector<1x8x8xf32>, vector<1x8x8xf32>, vector<1x8x8xf32>, vector<1x8x8xf32> -> vector<4x8x8xf32>
    "tpu.trace_start"() <{level = 10 : i32, message = "hqd,hkd->hqk"}> : () -> ()
    %cst_53 = arith.constant dense<0.000000e+00> : vector<4x8x8xf32>
    %188 = tpu.matmul %169, %178, %cst_53 {dimension_numbers = #tpu.dot_dimension_numbers<[2], [2], [1], [1], [0, 0, 0, 1, 1, 1], [0], [0]>} : vector<4x8x8xf32>, vector<4x8x8xf32>, vector<4x8x8xf32> -> vector<4x8x8xf32>
    "tpu.trace_stop"() : () -> ()
    %cst_54 = arith.constant dense<0xFF800000> : vector<4x8xf32>
    %189 = vector.multi_reduction <maximumf>, %188, %cst_54 [2] : vector<4x8x8xf32> to vector<4x8xf32>
    %190 = vector.shape_cast %189 : vector<4x8xf32> to vector<4x8x1xf32>
    %191 = vector.broadcast %190 : vector<4x8x1xf32> to vector<4x8x8xf32>
    %192 = arith.subf %188, %191 : vector<4x8x8xf32>
    %193 = math.exp %192 : vector<4x8x8xf32>
    %cst_55 = arith.constant dense<0.000000e+00> : vector<4x8xf32>
    %194 = vector.multi_reduction <add>, %193, %cst_55 [2] : vector<4x8x8xf32> to vector<4x8xf32>
    %195 = vector.shape_cast %194 : vector<4x8xf32> to vector<4x8x1xf32>
    %196 = vector.broadcast %195 : vector<4x8x1xf32> to vector<4x8x8xf32>
    %197 = arith.divf %193, %196 : vector<4x8x8xf32>
    "tpu.trace_start"() <{level = 10 : i32, message = "hqk,hkd->hqd"}> : () -> ()
    %cst_56 = arith.constant dense<0.000000e+00> : vector<4x8x8xf32>
    %198 = tpu.matmul %197, %187, %cst_56 {dimension_numbers = #tpu.dot_dimension_numbers<[2], [1], [1], [2], [0, 0, 0, 1, 1, 2], [0], [0]>} : vector<4x8x8xf32>, vector<4x8x8xf32>, vector<4x8x8xf32> -> vector<4x8x8xf32>
    "tpu.trace_stop"() : () -> ()
    %199 = vector.extract_strided_slice %198 {offsets = [0, 0, 0], sizes = [1, 8, 8], strides = [1, 1, 1]} : vector<4x8x8xf32> to vector<1x8x8xf32>
    %200 = vector.shape_cast %199 : vector<1x8x8xf32> to vector<8x8xf32>
    %201 = vector.extract_strided_slice %198 {offsets = [1, 0, 0], sizes = [1, 8, 8], strides = [1, 1, 1]} : vector<4x8x8xf32> to vector<1x8x8xf32>
    %202 = vector.shape_cast %201 : vector<1x8x8xf32> to vector<8x8xf32>
    %203 = vector.extract_strided_slice %198 {offsets = [2, 0, 0], sizes = [1, 8, 8], strides = [1, 1, 1]} : vector<4x8x8xf32> to vector<1x8x8xf32>
    %204 = vector.shape_cast %203 : vector<1x8x8xf32> to vector<8x8xf32>
    %205 = vector.extract_strided_slice %198 {offsets = [3, 0, 0], sizes = [1, 8, 8], strides = [1, 1, 1]} : vector<4x8x8xf32> to vector<1x8x8xf32>
    %206 = vector.shape_cast %205 : vector<1x8x8xf32> to vector<8x8xf32>
    %207 = tpu.concatenate %200, %202, %204, %206 in 1 : vector<8x8xf32>, vector<8x8xf32>, vector<8x8xf32>, vector<8x8xf32> -> vector<8x32xf32>
    %c0_57 = arith.constant 0 : index
    %c96_58 = arith.constant 96 : index
    %208 = vector.load %arg3[%c0_57, %c96_58] : memref<32x128xf32, #tpu.memory_space<vmem>>, vector<32x32xf32>
    %cst_59 = arith.constant dense<0.000000e+00> : vector<8x32xf32>
    %209 = tpu.matmul %207, %208, %cst_59 {dimension_numbers = #tpu.dot_dimension_numbers<[1], [0], [0], [1], [0, 0, 1, 1], [], []>} : vector<8x32xf32>, vector<32x32xf32>, vector<8x32xf32> -> vector<8x32xf32>
    %c5_60 = arith.constant 5 : index
    %c0_61 = arith.constant 0 : index
    %210 = vector.load %arg2[%c5_60, %c0_61] : memref<8x128xf32, #tpu.memory_space<vmem>>, vector<1x32xf32>
    %211 = vector.broadcast %210 : vector<1x32xf32> to vector<8x32xf32>
    %212 = arith.addf %209, %211 : vector<8x32xf32>
    %213 = arith.addf %131, %212 : vector<8x32xf32>
    %c2_62 = arith.constant 2 : index
    %c0_63 = arith.constant 0 : index
    %214 = vector.load %arg2[%c2_62, %c0_63] : memref<8x128xf32, #tpu.memory_space<vmem>>, vector<1x32xf32>
    %c3_64 = arith.constant 3 : index
    %c0_65 = arith.constant 0 : index
    %215 = vector.load %arg2[%c3_64, %c0_65] : memref<8x128xf32, #tpu.memory_space<vmem>>, vector<1x32xf32>
    %cst_66 = arith.constant dense<0.000000e+00> : vector<8xf32>
    %216 = vector.multi_reduction <add>, %213, %cst_66 [1] : vector<8x32xf32> to vector<8xf32>
    %217 = vector.shape_cast %216 : vector<8xf32> to vector<8x1xf32>
    %cst_67 = arith.constant 3.200000e+01 : f32
    %218 = vector.broadcast %cst_67 : f32 to vector<8x1xf32>
    %219 = arith.divf %217, %218 : vector<8x1xf32>
    %220 = vector.broadcast %219 : vector<8x1xf32> to vector<8x32xf32>
    %221 = arith.subf %213, %220 : vector<8x32xf32>
    %222 = arith.mulf %221, %221 : vector<8x32xf32>
    %cst_68 = arith.constant dense<0.000000e+00> : vector<8xf32>
    %223 = vector.multi_reduction <add>, %222, %cst_68 [1] : vector<8x32xf32> to vector<8xf32>
    %224 = vector.shape_cast %223 : vector<8xf32> to vector<8x1xf32>
    %cst_69 = arith.constant 3.200000e+01 : f32
    %225 = vector.broadcast %cst_69 : f32 to vector<8x1xf32>
    %226 = arith.divf %224, %225 : vector<8x1xf32>
    %227 = vector.broadcast %219 : vector<8x1xf32> to vector<8x32xf32>
    %228 = arith.subf %213, %227 : vector<8x32xf32>
    %cst_70 = arith.constant 9.99999974E-6 : f32
    %229 = vector.broadcast %cst_70 : f32 to vector<8x1xf32>
    %230 = arith.addf %226, %229 : vector<8x1xf32>
    %231 = math.rsqrt %230 : vector<8x1xf32>
    %232 = vector.broadcast %231 : vector<8x1xf32> to vector<8x32xf32>
    %233 = arith.mulf %228, %232 : vector<8x32xf32>
    %234 = vector.broadcast %214 : vector<1x32xf32> to vector<8x32xf32>
    %235 = arith.mulf %233, %234 : vector<8x32xf32>
    %236 = vector.broadcast %215 : vector<1x32xf32> to vector<8x32xf32>
    %237 = arith.addf %235, %236 : vector<8x32xf32>
    %c0_71 = arith.constant 0 : index
    %c0_72 = arith.constant 0 : index
    %238 = vector.load %arg4[%c0_71, %c0_72] : memref<32x128xf32, #tpu.memory_space<vmem>>, vector<32x128xf32>
    %cst_73 = arith.constant dense<0.000000e+00> : vector<8x128xf32>
    %239 = tpu.matmul %237, %238, %cst_73 {dimension_numbers = #tpu.dot_dimension_numbers<[1], [0], [0], [1], [0, 0, 1, 1], [], []>} : vector<8x32xf32>, vector<32x128xf32>, vector<8x128xf32> -> vector<8x128xf32>
    %c6_74 = arith.constant 6 : index
    %c0_75 = arith.constant 0 : index
    %240 = vector.load %arg2[%c6_74, %c0_75] : memref<8x128xf32, #tpu.memory_space<vmem>>, vector<1x128xf32>
    %241 = vector.broadcast %240 : vector<1x128xf32> to vector<8x128xf32>
    %242 = arith.addf %239, %241 : vector<8x128xf32>
    %cst_76 = arith.constant 5.000000e-01 : f32
    %243 = vector.broadcast %cst_76 : f32 to vector<8x128xf32>
    %244 = arith.mulf %243, %242 : vector<8x128xf32>
    %cst_77 = arith.constant 4.471500e-02 : f32
    %245 = vector.broadcast %cst_77 : f32 to vector<8x128xf32>
    %246 = arith.mulf %245, %242 : vector<8x128xf32>
    %247 = arith.mulf %246, %242 : vector<8x128xf32>
    %248 = arith.mulf %247, %242 : vector<8x128xf32>
    %249 = arith.addf %242, %248 : vector<8x128xf32>
    %cst_78 = arith.constant 0.797884583 : f32
    %250 = vector.broadcast %cst_78 : f32 to vector<8x128xf32>
    %251 = arith.mulf %250, %249 : vector<8x128xf32>
    %252 = math.tanh %251 : vector<8x128xf32>
    %cst_79 = arith.constant 1.000000e+00 : f32
    %253 = vector.broadcast %cst_79 : f32 to vector<8x128xf32>
    %254 = arith.addf %253, %252 : vector<8x128xf32>
    %255 = arith.mulf %244, %254 : vector<8x128xf32>
    %c0_80 = arith.constant 0 : index
    %c0_81 = arith.constant 0 : index
    %256 = vector.load %arg5[%c0_80, %c0_81] : memref<128x32xf32, #tpu.memory_space<vmem>>, vector<128x32xf32>
    %cst_82 = arith.constant dense<0.000000e+00> : vector<8x32xf32>
    %257 = tpu.matmul %255, %256, %cst_82 {dimension_numbers = #tpu.dot_dimension_numbers<[1], [0], [0], [1], [0, 0, 1, 1], [], []>} : vector<8x128xf32>, vector<128x32xf32>, vector<8x32xf32> -> vector<8x32xf32>
    %c7_83 = arith.constant 7 : index
    %c0_84 = arith.constant 0 : index
    %258 = vector.load %arg2[%c7_83, %c0_84] : memref<8x128xf32, #tpu.memory_space<vmem>>, vector<1x32xf32>
    %259 = vector.broadcast %258 : vector<1x32xf32> to vector<8x32xf32>
    %260 = arith.addf %257, %259 : vector<8x32xf32>
    %261 = arith.addf %213, %260 : vector<8x32xf32>
    %c0_85 = arith.constant 0 : index
    %c0_86 = arith.constant 0 : index
    %c0_87 = arith.constant 0 : index
    %262 = vector.load %arg6[%c0_85, %c0_86, %c0_87] : memref<1x8x32xf32, #tpu.memory_space<vmem>>, vector<1x8x32xf32>
    %263 = vector.shape_cast %262 : vector<1x8x32xf32> to vector<8x32xf32>
    %264 = vector.shape_cast %261 : vector<8x32xf32> to vector<1x8x32xf32>
    tpu.vector_store %arg6[%c0_85, %c0_86, %c0_87], %264 {strides = array<i32>} : memref<1x8x32xf32, #tpu.memory_space<vmem>>, vector<1x8x32xf32>,
    return
  }
  func.func @transform_0(%arg0: i32) -> (i32, i32, i32) {
    %c0_i32 = arith.constant 0 : i32
    %c0_i32_0 = arith.constant 0 : i32
    %c0_i32_1 = arith.constant 0 : i32
    return %arg0, %c0_i32, %c0_i32_0 : i32, i32, i32
  }
  func.func @transform_1(%arg0: i32) -> (i32, i32) {
    %c0_i32 = arith.constant 0 : i32
    %c0_i32_0 = arith.constant 0 : i32
    %c0_i32_1 = arith.constant 0 : i32
    return %c0_i32, %c0_i32_0 : i32, i32
  }
  func.func @transform_2(%arg0: i32) -> (i32, i32) {
    %c0_i32 = arith.constant 0 : i32
    %c0_i32_0 = arith.constant 0 : i32
    %c0_i32_1 = arith.constant 0 : i32
    return %c0_i32, %c0_i32_0 : i32, i32
  }
  func.func @transform_3(%arg0: i32) -> (i32, i32) {
    %c0_i32 = arith.constant 0 : i32
    %c0_i32_0 = arith.constant 0 : i32
    %c0_i32_1 = arith.constant 0 : i32
    return %c0_i32, %c0_i32_0 : i32, i32
  }
  func.func @transform_4(%arg0: i32) -> (i32, i32) {
    %c0_i32 = arith.constant 0 : i32
    %c0_i32_0 = arith.constant 0 : i32
    %c0_i32_1 = arith.constant 0 : i32
    return %c0_i32, %c0_i32_0 : i32, i32
  }
  func.func @transform_5(%arg0: i32) -> (i32, i32, i32) {
    %c0_i32 = arith.constant 0 : i32
    %c0_i32_0 = arith.constant 0 : i32
    %c0_i32_1 = arith.constant 0 : i32
    return %arg0, %c0_i32, %c0_i32_0 : i32, i32, i32
  }
}

</mosaic_0001>

<bundles_post_ra>
// kernel: transformer_encoder.1
= control target key start
LH: loop header
LB: loop body
LE: loop exit
PB: predicated region body
PF: predicated region fallthrough
CT: control target
= control target key end

     0   :  { %10 = vsyncpa [#allocation3], 0  ;;  %s3619_s0 = inlined_call_operand.vmem [shape: f32[2,8,32], index: 0, kind: input, shape index: {}]   ;;  %s3620_s1 = inlined_call_operand.vmem [shape: f32[8,128], index: 1, kind: input, shape index: {}]   ;;  %s3621_s2 = inlined_call_operand.vmem [shape: f32[32,128], index: 2, kind: input, shape index: {}]   ;;  %s3622_s3 = inlined_call_operand.vmem [shape: f32[32,128], index: 3, kind: input, shape index: {}]   ;;  %s3623_s4 = inlined_call_operand.vmem [shape: f32[128,32], index: 4, kind: input, shape index: {}]   ;;  %s3624_s5 = inlined_call_operand.hbm [shape: f32[2,8,32], index: 5, kind: output, shape index: {}]  }
   0x1   :  { %12 = vsyncpa [#allocation3 + $0x1], 0  ;;  %s3038_s18 = smov 0   ;;  %s3040_s19 = smov 0  }
   0x2   :  { %s3042_s20 = smov 0   ;;  %s3044_s21 = smov 0  }
   0x3 LB: > { %s3059_s22 = sadd.s32 4294967295, %s2994_s21   ;;  %s2472_s23 = sadd.s32 4294967294, %s2994_s21   ;;  %s2994_s21 = sphi %s3044_s21, %s3630_s21   ;;  %s2990_s20 = sphi %s3042_s20, %s3629_s20   ;;  %s2986_s19 = sphi %s3040_s19, %s3628_s19   ;;  %s2982_s18 = sphi %s3038_s18, %s3627_s18  }
   0x4   : > { %s3063_s24 = sadd.s32 1, %s2994_s21   ;;  %s135_s25 = sadd.s32 1, %s2990_s20 }
   0x5   : > { %s132_s26 = ssub.s32 %s2994_s21, %s3063_s24  ;;  %p145_p0 = scmp.ne.s32.totalorder %s2990_s20, %s2986_s19 }
   0x6   : > { %p133_p1 = scmp.eq.s32.totalorder %s132_s26, 0  ;;  %p146_p2 = scmp.eq.s32.totalorder %s3059_s22, 1 }
   0x7   : > { %p151_p3 = scmp.ne.s32.totalorder %s2986_s19, %s2982_s18  ;;  %p152_p4 = scmp.eq.s32.totalorder %s2472_s23, 1 }
   0x8   : > { %s3074_s27 = scalar_select %p133_p1, %s2990_s20, %s135_s25  }
   0x9   : > { %p3076_p5 = por %p146_p2, %p145_p0  ;;  %p3080_p6 = por %p152_p4, %p151_p3 }
   0xa   : > { %p2475_p7 = scmp.ge.s32.totalorder %s2994_s21, 1  ;;  %p189_p8 = scmp.lt.s32.totalorder %s2994_s21, 3 }
   0xc   : > { %p190_p9 = pnand %p2475_p7, %p189_p8 }
   0xd   : > { %p216_p10 = scmp.lt.s32.totalorder (!%p190_p9), %s3059_s22, 1  ;;  %s2998_s8 = smov (!%p190_p9), 104  }
   0xe   : > { %193 = sbr.rel (%p190_p9) target bundleno = 5003 (0x138b), region = 40  ;;  %s3000_s10 = smov (!%p190_p9), 112  }
   0xf   : > { %s3001_s11 = smov (!%p190_p9), 96   ;;  %s3002_s12 = smov (!%p190_p9), 64  }
  0x10   : > { %s3003_s13 = smov (!%p190_p9), 32   ;;  %s3004_s14 = smov (!%p190_p9), 8  }
  0x11   : > { %s3005_s15 = smov (!%p190_p9), 16   ;;  %s3006_s16 = smov (!%p190_p9), 24  }
  0x13   : > { %s217_s30 = scalar_select %p216_p10, %s3059_s22, 1  ;;  %vm223_vm0 = vcmask 261120   ;;  %v3100_v7 = vld [vmem:[%s3621_s2 + $0x18] sm:$0xff]  ;;  %v2996_v8 = vmov 0.0   ;;  %v3106_v9 = vld [vmem:[%s3621_s2 + $0x10] sm:$0xff]  ;;  %vm2997_vm1 = vmmov 0  }
  0x14   : > { %2624 = vmatprep.subr.mxu1 %v2996_v8  ;;  %2632 = vmatprep.mubr.msk.f32.mxu1 %vm2997_vm1, %v2996_v8  ;;  %v3116_v10 = vld [vmem:[%s3621_s2 + $0x8] sm:$0xff]  ;;  %v3125_v11 = vld [vmem:[%s3621_s2] sm:$0xff]  ;;  %vm339_vm2 = vcmask 64512   ;;  %vm1003_vm3 = vcmask 130048   ;;  %vm1005_vm4 = vcmask 195584  }
  0x15   : > { %s2477_s6 = sshll.u32 %s217_s30, 3  ;;  %2625 = vmatpush3.msra.mxu1 %v3100_v7  ;;  %2645 = vmatprep.subr.mxu0 %v2996_v8  ;;  %v3134_v16 = vld [vmem:[%s3620_s1] ss:$0 sm:$0xff]  ;;  %v3139_v18 = vld [vmem:[%s3620_s1 + $0x1] ss:$0 sm:$0xff] }
  0x16   : > { %s219_s9 = scalar_lea.vmem %s3619_s0, %s2477_s6  ;;  %2626 = vmatprep.subr.mxu1 %v2996_v8  ;;  %2647 = vmatprep.mubr.msk.f32.mxu0 %vm2997_vm1, %v2996_v8  ;;  %v3149_v21 = vld [vmem:[%s3620_s1 + $0x4] ss:$0 sm:$0xff] }
  0x17   : > { %v3091_v0 = vld [vmem:[%s219_s9] sm:$0xff]  ;;  %2627 = vmatpush3.msra.mxu1 %v3106_v9  ;;  %s2999_s9 = smov 120  }
  0x18   : > { %v224_v1 = vsel %vm223_vm0, %v3091_v0, 0.0  ;;  %2628 = vmatprep.subr.mxu1 %v2996_v8 }
  0x19   : > { %225 = vadd.xlane.f32.xlu0 %v224_v1  ;;  %2629 = vmatpush3.msra.mxu1 %v3116_v10 }
  0x1a   : > { %2630 = vmatprep.subr.mxu1 %v2996_v8 }
  0x1b   : > { %2631 = vmatpush3.msra.mxu1 %v3125_v11 }
  0x1c   : > { %2635 = vmatprep.subr.mxu1 %v2996_v8 }
  0xa2   : > { %v226_v2 = vpop.xlane.xlu0 %225 }
  0xa3   : > { %v228_v3 = vmul.f32 0.03125, %v226_v2 }
  0xa5   : > { %v229_v4 = vsub.f32 %v3091_v0, %v228_v3 }
  0xa7   : > { %v230_v5 = vmul.f32 %v229_v4, %v229_v4 }
  0xa9   : > { %v231_v6 = vsel %vm223_vm0, %v230_v5, 0.0 }
  0xaa   : > { %232 = vadd.xlane.f32.xlu0 %v231_v6 }
 0x133   : > { %v233_v12 = vpop.xlane.xlu0 %232 }
 0x134   : > { %v234_v13 = vmul.f32 0.03125, %v233_v12 }
 0x136   : > { %v235_v14 = vadd.f32 1e-05, %v234_v13 }
 0x138   : > { %2890 = vrsqrt.f32 %v235_v14 }
 0x145   : > { %v2891_v15 = vpop.eup %2890 }
 0x146   : > { %v237_v17 = vmul.f32 %v2891_v15, %v229_v4 }
 0x148   : > { %v242_v19 = vmul.f32 %v3134_v16, %v237_v17 }
 0x14a   : > { %v247_v20 = vadd.f32 %v3139_v18, %v242_v19 }
 0x14c   : > { %2633 = vmatmul.mubr.msk.f32.vlgmr.msra.gmra.mxu1 %vm223_vm0, %v247_v20 }
 0x14d   : > { %2637 = vmatprep.mubr.msk.f32.mxu1 %vm2997_vm1, %v2996_v8 }
 0x20c   : > { %v326_v22 = vpop.f32.mrf.mxu1 }
 0x20d   : > { %v327_v23 = vadd.f32 %v3149_v21, %v326_v22 }
 0x20e   : > { %v2634_v24 = vpop.f32.mrf.mxu1 }
 0x20f   : > { %335 = vrot.lane.b32.xlu0 %v327_v23, %s2998_s8  ;;  %331 = vrot.lane.b32.xlu1 %v327_v23, %s2999_s9 }
 0x213   : > { %333 = vrot.lane.b32.xlu1 %v327_v23, %s3000_s10 }
 0x217   : > { %337 = vrot.lane.b32.xlu1 %v327_v23, %s3001_s11 }
 0x281   : > { %v3156_v25 = vpop.permute.xlu1 %331  ;;  %v3164_v27 = vpop.permute.xlu0 %335 }
 0x282   : > { %414 = vrot.lane.b32.xlu1 %v3156_v25, %s3001_s11 }
 0x285   : > { %v3160_v26 = vpop.permute.xlu1 %333 }
 0x286   : > { %490 = vrot.lane.b32.xlu1 %v3160_v26, %s3001_s11 }
 0x289   : > { %v338_v28 = vpop.permute.xlu1 %337 }
 0x28a   : > { %566 = vrot.lane.b32.xlu1 %v3164_v27, %s3001_s11  ;;  %2636 = vmatpush3.xpose.msk.msra.mxu1 %vm339_vm2, %v338_v28 }
 0x28b   : > { %2640 = vmatprep.subr.mxu1 %v2996_v8 }
 0x28d   : > { %2638 = vmatmul.mubr.msk.f32.vlgmr.msra.gmra.mxu1 %vm339_vm2, %v327_v23 }
 0x28e   : > { %2642 = vmatprep.mubr.msk.f32.mxu1 %vm2997_vm1, %v2996_v8 }
 0x2f4   : > { %v415_v29 = vpop.permute.xlu1 %414 }
 0x2f5   : > { %2641 = vmatpush3.xpose.msk.msra.mxu1 %vm339_vm2, %v415_v29 }
 0x2f6   : > { %2650 = vmatprep.subr.mxu1 %v2996_v8 }
 0x2f8   : > { %2643 = vmatmul.mubr.msk.f32.vlgmr.msra.gmra.mxu1 %vm339_vm2, %v3156_v25  ;;  %v491_v30 = vpop.permute.xlu1 %490 }
 0x2f9   : > { %2646 = vmatpush3.xpose.msk.msra.mxu0 %vm339_vm2, %v491_v30  ;;  %2652 = vmatprep.mubr.msk.f32.mxu1 %vm2997_vm1, %v2996_v8 }
 0x2fa   : > { %2655 = vmatprep.subr.mxu0 %v2996_v8 }
 0x2fc   : > { %2648 = vmatmul.mubr.msk.f32.vlgmr.msra.gmra.mxu0 %vm339_vm2, %v3160_v26  ;;  %v567_v31 = vpop.permute.xlu1 %566 }
 0x2fd   : > { %2651 = vmatpush3.xpose.msk.msra.mxu1 %vm339_vm2, %v567_v31  ;;  %2657 = vmatprep.mubr.msk.f32.mxu0 %vm2997_vm1, %v2996_v8 }
 0x2fe   : > { %2660 = vmatprep.subr.mxu1 %v2996_v8 }
 0x300   : > { %2653 = vmatmul.mubr.msk.f32.vlgmr.msra.gmra.mxu1 %vm339_vm2, %v3164_v27 }
 0x301   : > { %2662 = vmatprep.mubr.msk.f32.mxu1 %vm2997_vm1, %v2996_v8 }
 0x34d   : > { %v410_v32 = vpop.f32.mrf.mxu1 }
 0x34e   : > { %v642_v33 = vsel %vm339_vm2, %v410_v32, -inf }
 0x34f   : > { %643 = vmax.xlane.f32.xlu1 %v642_v33  ;;  %v2639_v34 = vpop.f32.mrf.mxu1 }
 0x3b8   : > { %v486_v35 = vpop.f32.mrf.mxu1 }
 0x3b9   : > { %v645_v36 = vsel %vm339_vm2, %v486_v35, -inf }
 0x3ba   : > { %646 = vmax.xlane.f32.xlu0 %v645_v36  ;;  %v2644_v37 = vpop.f32.mrf.mxu1 }
 0x3bc   : > { %v562_v38 = vpop.f32.mrf.mxu0 }
 0x3bd   : > { %v648_v39 = vsel %vm339_vm2, %v562_v38, -inf }
 0x3be   : > { %v2649_v40 = vpop.f32.mrf.mxu0  ;;  %649 = vmax.xlane.f32.xlu1 %v648_v39 }
 0x3c0   : > { %v638_v41 = vpop.f32.mrf.mxu1 }
 0x3c1   : > { %v651_v42 = vsel %vm339_vm2, %v638_v41, -inf }
 0x3c2   : > { %652 = vmax.xlane.f32.xlu0 %v651_v42  ;;  %v2654_v43 = vpop.f32.mrf.mxu1 }
 0x3c3   : > { %v3246_v43 = vld [vmem:[%s3620_s1 + $0x5] ss:$0 sm:$0xff] }
 0x3cf   : > { %686 = vrot.lane.b32.xlu1 %v327_v23, %s3002_s12 }
 0x3d8   : > { %v644_v44 = vpop.xlane.xlu1 %643 }
 0x3d9   : > { %v654_v45 = vsub.f32 %v410_v32, %v644_v44 }
 0x3db   : > { %v658_v46 = vmul.f32 1.442695, %v654_v45 }
 0x3dd   : > { %2892 = vpow2.f32 %v658_v46 }
 0x3ea   : > { %v2893_v47 = vpop.eup %2892 }
 0x3eb   : > { %v666_v48 = vsel %vm339_vm2, %v2893_v47, 0.0 }
 0x3f3   : > { %667 = vadd.xlane.f32.xlu1 %v666_v48 }
 0x443   : > { %v647_v49 = vpop.xlane.xlu0 %646 }
 0x444   : > { %v655_v50 = vsub.f32 %v486_v35, %v647_v49 }
 0x446   : > { %v660_v51 = vmul.f32 1.442695, %v655_v50 }
 0x447   : > { %v650_v52 = vpop.xlane.xlu1 %649 }
 0x448   : > { %2894 = vpow2.f32 %v660_v51  ;;  %v656_v53 = vsub.f32 %v562_v38, %v650_v52 }
 0x44a   : > { %v662_v54 = vmul.f32 1.442695, %v656_v53 }
 0x44b   : > { %v687_v55 = vpop.permute.xlu1 %686  ;;  %v653_v56 = vpop.xlane.xlu0 %652 }
 0x44c   : > { %2896 = vpow2.f32 %v662_v54  ;;  %v657_v57 = vsub.f32 %v638_v41, %v653_v56  ;;  %2656 = vmatpush3.msra.mxu0 %v687_v55  ;;  %v3259_v54 = vld [vmem:[%s3622_s3 + $0x18] sm:$0xff]  ;;  %v3271_v55 = vld [vmem:[%s3622_s3 + $0x8] sm:$0xff]  ;;  %v3278_v56 = vld [vmem:[%s3622_s3] sm:$0xff] }
 0x44d   : > { %2665 = vmatprep.subr.mxu0 %v2996_v8 }
 0x44e   : > { %v664_v58 = vmul.f32 1.442695, %v657_v57 }
 0x450   : > { %2898 = vpow2.f32 %v664_v58 }
 0x455   : > { %v2895_v59 = vpop.eup %2894 }
 0x456   : > { %v669_v60 = vsel %vm339_vm2, %v2895_v59, 0.0 }
 0x457   : > { %670 = vadd.xlane.f32.xlu0 %v669_v60 }
 0x459   : > { %v2897_v61 = vpop.eup %2896 }
 0x45a   : > { %v672_v62 = vsel %vm339_vm2, %v2897_v61, 0.0 }
 0x45b   : > { %673 = vadd.xlane.f32.xlu1 %v672_v62 }
 0x45d   : > { %v2899_v63 = vpop.eup %2898 }
 0x45e   : > { %v675_v1 = vsel %vm339_vm2, %v2899_v63, 0.0 }
 0x45f   : > { %676 = vadd.xlane.f32.xlu0 %v675_v1 }
 0x46c   : > { %838 = vrot.lane.b32.xlu1 %v3160_v26, %s3002_s12 }
 0x470   : > { %914 = vrot.lane.b32.xlu1 %v3164_v27, %s3002_s12 }
 0x474   : > { %1024 = vrot.lane.b32.xlu1 %v3106_v9, %s3003_s13 }
 0x475   : > { %762 = vrot.lane.b32.xlu0 %v3156_v25, %s3002_s12 }
 0x478   : > { %1022 = vrot.lane.b32.xlu1 %v3116_v10, %s3003_s13 }
 0x479   : > { %1026 = vrot.lane.b32.xlu0 %v3100_v7, %s3003_s13 }
 0x47c   : > { %v668_v2 = vpop.xlane.xlu1 %667 }
 0x47d   : > { %2900 = vrcp.f32 %v668_v2 }
 0x48a   : > { %v2901_v3 = vpop.eup %2900 }
 0x48b   : > { %v679_v4 = vmul.f32 %v2901_v3, %v2893_v47  ;;  %v3310_v3 = vld [vmem:[%s3623_s4 + $0x78] sm:$0xff] }
 0x48d   : > { %2658 = vmatmul.mubr.msk.f32.vlgmr.msra.gmra.mxu0 %vm339_vm2, %v679_v4  ;;  %v3317_v4 = vld [vmem:[%s3623_s4 + $0x70] sm:$0xff] }
 0x48e   : > { %2667 = vmatprep.mubr.msk.f32.mxu0 %vm2997_vm1, %v2996_v8 }
 0x4e0   : > { %v671_v5 = vpop.xlane.xlu0 %670 }
 0x4e1   : > { %2902 = vrcp.f32 %v671_v5  ;;  %v3324_v5 = vld [vmem:[%s3623_s4 + $0x68] sm:$0xff] }
 0x4e4   : > { %v674_v6 = vpop.xlane.xlu1 %673 }
 0x4e5   : > { %2904 = vrcp.f32 %v674_v6  ;;  %v3331_v6 = vld [vmem:[%s3623_s4 + $0x60] sm:$0xff] }
 0x4e8   : > { %v839_v12 = vpop.permute.xlu1 %838  ;;  %v677_v13 = vpop.xlane.xlu0 %676 }
 0x4e9   : > { %2906 = vrcp.f32 %v677_v13  ;;  %2666 = vmatpush3.msra.mxu0 %v839_v12  ;;  %v3338_v12 = vld [vmem:[%s3623_s4 + $0x58] sm:$0xff]  ;;  %v3344_v13 = vld [vmem:[%s3623_s4 + $0x50] sm:$0xff] }
 0x4ea   : > { %2697 = vmatprep.subr.mxu0 %v2996_v8 }
 0x4ec   : > { %v763_v14 = vpop.permute.xlu0 %762  ;;  %v915_v19 = vpop.permute.xlu1 %914 }
 0x4ed   : > { %2661 = vmatpush3.msra.mxu1 %v763_v14  ;;  %v3350_v14 = vld [vmem:[%s3623_s4 + $0x48] sm:$0xff] }
 0x4ee   : > { %v2903_v15 = vpop.eup %2902  ;;  %2670 = vmatprep.subr.mxu1 %v2996_v8 }
 0x4ef   : > { %v681_v17 = vmul.f32 %v2903_v15, %v2895_v59  ;;  %v3357_v15 = vld [vmem:[%s3623_s4 + $0x40] sm:$0xff] }
 0x4f0   : > { %v1027_v25 = vpop.permute.xlu0 %1026  ;;  %v1025_v26 = vpop.permute.xlu1 %1024 }
 0x4f1   : > { %2663 = vmatmul.mubr.msk.f32.vlgmr.msra.gmra.mxu1 %vm339_vm2, %v681_v17  ;;  %v3364_v17 = vld [vmem:[%s3623_s4 + $0x38] sm:$0xff] }
 0x4f2   : > { %v2905_v20 = vpop.eup %2904  ;;  %2671 = vmatpush3.msra.mxu1 %v915_v19  ;;  %2672 = vmatprep.mubr.msk.f32.mxu1 %vm2997_vm1, %v2996_v8  ;;  %v3371_v19 = vld [vmem:[%s3623_s4 + $0x30] sm:$0xff] }
 0x4f3   : > { %v683_v22 = vmul.f32 %v2905_v20, %v2897_v61  ;;  %2675 = vmatprep.subr.mxu1 %v2996_v8  ;;  %v3287_v61 = vld [vmem:[%s3620_s1 + $0x2] ss:$0 sm:$0xff]  ;;  %v3378_v20 = vld [vmem:[%s3623_s4 + $0x28] sm:$0xff] }
 0x4f4   : > { %v1023_v29 = vpop.permute.xlu1 %1022 }
 0x4f5   : > { %2668 = vmatmul.mubr.msk.f32.vlgmr.msra.gmra.mxu0 %vm339_vm2, %v683_v22  ;;  %v3385_v22 = vld [vmem:[%s3623_s4 + $0x20] sm:$0xff] }
 0x4f6   : > { %v2907_v23 = vpop.eup %2906  ;;  %2729 = vmatprep.mubr.msk.f32.mxu0 %vm2997_vm1, %v2996_v8  ;;  %2698 = vmatpush3.msra.mxu0 %v3310_v3 }
 0x4f7   : > { %v685_v24 = vmul.f32 %v2907_v23, %v2899_v63  ;;  %v3292_v63 = vld [vmem:[%s3620_s1 + $0x3] ss:$0 sm:$0xff]  ;;  %2699 = vmatprep.subr.mxu0 %v2996_v8  ;;  %v3392_v23 = vld [vmem:[%s3623_s4 + $0x18] sm:$0xff] }
 0x4f8   : > { %2700 = vmatpush3.msra.mxu0 %v3317_v4 }
 0x4f9   : > { %2673 = vmatmul.mubr.msk.f32.vlgmr.msra.gmra.mxu1 %vm339_vm2, %v685_v24  ;;  %2701 = vmatprep.subr.mxu0 %v2996_v8  ;;  %v3399_v24 = vld [vmem:[%s3623_s4 + $0x10] sm:$0xff] }
 0x4fa   : > { %2683 = vmatprep.mubr.msk.f32.mxu1 %vm2997_vm1, %v2996_v8  ;;  %2676 = vmatpush3.msra.mxu1 %v1027_v25  ;;  %v3406_v25 = vld [vmem:[%s3623_s4 + $0x8] sm:$0xff] }
 0x4fb   : > { %2677 = vmatprep.subr.mxu1 %v2996_v8  ;;  %2702 = vmatpush3.msra.mxu0 %v3324_v5 }
 0x4fc   : > { %2678 = vmatpush3.msra.mxu1 %v1025_v26  ;;  %2703 = vmatprep.subr.mxu0 %v2996_v8  ;;  %v3413_v26 = vld [vmem:[%s3623_s4] sm:$0xff] }
 0x4fd   : > { %2679 = vmatprep.subr.mxu1 %v2996_v8  ;;  %2704 = vmatpush3.msra.mxu0 %v3331_v6 }
 0x4fe   : > { %2680 = vmatpush3.msra.mxu1 %v1023_v29  ;;  %2705 = vmatprep.subr.mxu0 %v2996_v8 }
 0x4ff   : > { %2681 = vmatprep.subr.mxu1 %v2996_v8  ;;  %2706 = vmatpush3.msra.mxu0 %v3338_v12 }
 0x500   : > { %2707 = vmatprep.subr.mxu0 %v2996_v8 }
 0x501   : > { %2708 = vmatpush3.msra.mxu0 %v3344_v13 }
 0x502   : > { %2709 = vmatprep.subr.mxu0 %v2996_v8 }
 0x503   : > { %2710 = vmatpush3.msra.mxu0 %v3350_v14 }
 0x504   : > { %2711 = vmatprep.subr.mxu0 %v2996_v8 }
 0x505   : > { %2712 = vmatpush3.msra.mxu0 %v3357_v15 }
 0x506   : > { %2713 = vmatprep.subr.mxu0 %v2996_v8 }
 0x507   : > { %2714 = vmatpush3.msra.mxu0 %v3364_v17 }
 0x508   : > { %2715 = vmatprep.subr.mxu0 %v2996_v8 }
 0x509   : > { %2716 = vmatpush3.msra.mxu0 %v3371_v19 }
 0x50a   : > { %2717 = vmatprep.subr.mxu0 %v2996_v8 }
 0x50b   : > { %2718 = vmatpush3.msra.mxu0 %v3378_v20 }
 0x50c   : > { %2719 = vmatprep.subr.mxu0 %v2996_v8 }
 0x50d   : > { %2720 = vmatpush3.msra.mxu0 %v3385_v22 }
 0x50e   : > { %2721 = vmatprep.subr.mxu0 %v2996_v8 }
 0x50f   : > { %2722 = vmatpush3.msra.mxu0 %v3392_v23 }
 0x510   : > { %2723 = vmatprep.subr.mxu0 %v2996_v8 }
 0x511   : > { %2724 = vmatpush3.msra.mxu0 %v3399_v24 }
 0x512   : > { %2725 = vmatprep.subr.mxu0 %v2996_v8 }
 0x513   : > { %2726 = vmatpush3.msra.mxu0 %v3406_v25 }
 0x514   : > { %2727 = vmatprep.subr.mxu0 %v2996_v8 }
 0x515   : > { %2728 = vmatpush3.msra.mxu0 %v3413_v26 }
 0x516   : > { %2773 = vmatprep.subr.mxu0 %v2996_v8 }
 0x54d   : > { %v758_v27 = vpop.f32.mrf.mxu0 }
 0x54f   : > { %v2659_v28 = vpop.f32.mrf.mxu0 }
 0x5b1   : > { %v834_v30 = vpop.f32.mrf.mxu1 }
 0x5b2   : > { %991 = vrot.lane.b32.xlu0 %v834_v30, %s3004_s14 }
 0x5b3   : > { %v2664_v31 = vpop.f32.mrf.mxu1 }
 0x5b5   : > { %v910_v32 = vpop.f32.mrf.mxu0 }
 0x5b6   : > { %995 = vrot.lane.b32.xlu0 %v910_v32, %s3005_s15 }
 0x5b7   : > { %v2669_v33 = vpop.f32.mrf.mxu0 }
 0x5b9   : > { %v986_v34 = vpop.f32.mrf.mxu1 }
 0x5ba   : > { %1020 = vrot.lane.b32.xlu0 %v3125_v11, %s3003_s13  ;;  %999 = vrot.lane.b32.xlu1 %v986_v34, %s3006_s16 }
 0x5bb   : > { %v2674_v35 = vpop.f32.mrf.mxu1 }
 0x624   : > { %v992_v36 = vpop.permute.xlu0 %991 }
 0x625   : > { %v1002_v38 = vsel %vm339_vm2, %v758_v27, %v992_v36  ;;  %v3422_v27 = vld [vmem:[%s3620_s1 + $0x6] ss:$0 sm:$0xff] }
 0x628   : > { %v996_v37 = vpop.permute.xlu0 %995 }
 0x629   : > { %v1004_v39 = vsel %vm1003_vm3, %v1002_v38, %v996_v37 }
 0x62c   : > { %v1021_v40 = vpop.permute.xlu0 %1020  ;;  %v1000_v41 = vpop.permute.xlu1 %999 }
 0x62d   : > { %v1006_v42 = vsel %vm1005_vm4, %v1004_v39, %v1000_v41  ;;  %2682 = vmatpush3.msra.mxu1 %v1021_v40  ;;  %v3430_v40 = vld [vmem:[%s3620_s1 + $0x7] ss:$0 sm:$0xff] }
 0x62e   : > { %2684 = vmatmul.mubr.msk.f32.vlgmr.msra.gmra.mxu1 %vm223_vm0, %v1006_v42  ;;  %2686 = vmatprep.subr.mxu1 %v2996_v8 }
 0x62f   : > { %2694 = vmatprep.mubr.msk.f32.mxu1 %vm2997_vm1, %v2996_v8  ;;  %2687 = vmatpush3.msra.mxu1 %v3259_v54 }
 0x630   : > { %2688 = vmatprep.subr.mxu1 %v2996_v8 }
 0x6ee   : > { %v1101_v44 = vpop.f32.mrf.mxu1 }
 0x6ef   : > { %v1102_v45 = vadd.f32 %v3246_v43, %v1101_v44 }
 0x6f0   : > { %v2685_v46 = vpop.f32.mrf.mxu1 }
 0x6f1   : > { %v3250_v47 = vadd.f32 %v1102_v45, %v3091_v0  ;;  %v3265_v0 = vld [vmem:[%s3622_s3 + $0x10] sm:$0xff] }
 0x6f2   : > { %2689 = vmatpush3.msra.mxu1 %v3265_v0 }
 0x6f3   : > { %v1108_v48 = vsel %vm223_vm0, %v3250_v47, 0.0  ;;  %2690 = vmatprep.subr.mxu1 %v2996_v8 }
 0x6f4   : > { %1109 = vadd.xlane.f32.xlu1 %v1108_v48  ;;  %2691 = vmatpush3.msra.mxu1 %v3271_v55 }
 0x6f5   : > { %2692 = vmatprep.subr.mxu1 %v2996_v8 }
 0x6f6   : > { %2693 = vmatpush3.msra.mxu1 %v3278_v56 }
 0x6f7   : > { %2732 = vmatprep.subr.mxu1 %v2996_v8 }
 0x77d   : > { %v1110_v49 = vpop.xlane.xlu1 %1109 }
 0x77e   : > { %v1111_v50 = vmul.f32 0.03125, %v1110_v49 }
 0x780   : > { %v1112_v51 = vsub.f32 %v3250_v47, %v1111_v50 }
 0x782   : > { %v1113_v52 = vmul.f32 %v1112_v51, %v1112_v51 }
 0x784   : > { %v1114_v53 = vsel %vm223_vm0, %v1113_v52, 0.0 }
 0x785   : > { %1115 = vadd.xlane.f32.xlu0 %v1114_v53 }
 0x80e   : > { %v1116_v57 = vpop.xlane.xlu0 %1115 }
 0x80f   : > { %v1117_v58 = vmul.f32 0.03125, %v1116_v57 }
 0x811   : > { %v1118_v59 = vadd.f32 1e-05, %v1117_v58 }
 0x813   : > { %2908 = vrsqrt.f32 %v1118_v59 }
 0x820   : > { %v2909_v60 = vpop.eup %2908 }
 0x821   : > { %v1120_v62 = vmul.f32 %v2909_v60, %v1112_v51 }
 0x823   : > { %v1125_v1 = vmul.f32 %v3287_v61, %v1120_v62 }
 0x825   : > { %v1130_v2 = vadd.f32 %v3292_v63, %v1125_v1 }
 0x827   : > { %2695 = vmatmul.mubr.msk.f32.vlgmr.msra.gmra.mxu1 %vm223_vm0, %v1130_v2 }
 0x828   : > { %2733 = vmatpush3.msra.mxu1 %v3100_v7  ;;  %2740 = vmatprep.mubr.msk.f32.mxu1 %vm2997_vm1, %v2996_v8 }
 0x829   : > { %2734 = vmatprep.subr.mxu1 %v2996_v8 }
 0x82a   : > { %2735 = vmatpush3.msra.mxu1 %v3106_v9 }
 0x82b   : > { %2736 = vmatprep.subr.mxu1 %v2996_v8 }
 0x82c   : > { %2737 = vmatpush3.msra.mxu1 %v3116_v10 }
 0x82d   : > { %2738 = vmatprep.subr.mxu1 %v2996_v8 }
 0x82e   : > { %2739 = vmatpush3.msra.mxu1 %v3125_v11 }
 0x82f   : > { %2743 = vmatprep.subr.mxu1 %v2996_v8 }
 0x8e7   : > { %v1209_v28 = vpop.f32.mrf.mxu1 }
 0x8e8   : > { %v1210_v29 = vadd.f32 %v3422_v27, %v1209_v28 }
 0x8e9   : > { %v2696_v30 = vpop.f32.mrf.mxu1 }
 0x8ea   : > { %v1214_v31 = vmul.f32 0.044715, %v1210_v29  ;;  %v1213_v37 = vmul.f32 0.5, %v1210_v29 }
 0x8ec   : > { %v1215_v32 = vmul.f32 %v1214_v31, %v1210_v29 }
 0x8ee   : > { %v1216_v33 = vmul.f32 %v1215_v32, %v1210_v29 }
 0x8f0   : > { %v1217_v34 = vadd.f32 %v1216_v33, %v1210_v29 }
 0x8f2   : > { %v1218_v35 = vmul.f32 0.7978846, %v1217_v34 }
 0x8f4   : > { %2910 = vtanh.f32 %v1218_v35 }
 0x901   : > { %v2911_v36 = vpop.eup %2910 }
 0x902   : > { %v1220_v38 = vadd.f32 1.0, %v2911_v36 }
 0x904   : > { %v1221_v39 = vmul.f32 %v1220_v38, %v1213_v37 }
 0x906   : > { %2730 = vmatmul.mubr.f32.vlgmr.msra.gmra.mxu0 %v1221_v39 }
 0x907   : > { %2775 = vmatprep.mubr.msk.f32.mxu0 %vm2997_vm1, %v2996_v8 }
 0x9c6   : > { %v1309_v41 = vpop.f32.mrf.mxu0 }
 0x9c7   : > { %v1310_v42 = vadd.f32 %v3430_v40, %v1309_v41 }
 0x9c8   : > { %v2731_v44 = vpop.f32.mrf.mxu0 }
 0x9c9   : > { %v3434_v45 = vadd.f32 %v1310_v42, %v3250_v47 }
 0x9cb   : > { %v1316_v46 = vsel %vm223_vm0, %v3434_v45, 0.0 }
 0x9cc   : > { %1317 = vadd.xlane.f32.xlu0 %v1316_v46 }
 0xa55   : > { %v1318_v48 = vpop.xlane.xlu0 %1317 }
 0xa56   : > { %v1319_v49 = vmul.f32 0.03125, %v1318_v48 }
 0xa58   : > { %v1320_v50 = vsub.f32 %v3434_v45, %v1319_v49 }
 0xa5a   : > { %v1321_v51 = vmul.f32 %v1320_v50, %v1320_v50 }
 0xa5c   : > { %v1322_v52 = vsel %vm223_vm0, %v1321_v51, 0.0 }
 0xa5d   : > { %1323 = vadd.xlane.f32.xlu1 %v1322_v52 }
 0xae6   : > { %v1324_v53 = vpop.xlane.xlu1 %1323 }
 0xae7   : > { %v1325_v57 = vmul.f32 0.03125, %v1324_v53 }
 0xae9   : > { %v1326_v58 = vadd.f32 1e-05, %v1325_v57 }
 0xaeb   : > { %2912 = vrsqrt.f32 %v1326_v58 }
 0xaf8   : > { %v2913_v59 = vpop.eup %2912 }
 0xaf9   : > { %v1328_v60 = vmul.f32 %v2913_v59, %v1320_v50 }
 0xafb   : > { %v1333_v47 = vmul.f32 %v3134_v16, %v1328_v60 }
 0xafd   : > { %v1338_v62 = vadd.f32 %v3139_v18, %v1333_v47 }
 0xaff   : > { %2741 = vmatmul.mubr.msk.f32.vlgmr.msra.gmra.mxu1 %vm223_vm0, %v1338_v62 }
 0xb00   : > { %2745 = vmatprep.mubr.msk.f32.mxu1 %vm2997_vm1, %v2996_v8 }
 0xbbf   : > { %v1413_v1 = vpop.f32.mrf.mxu1 }
 0xbc0   : > { %v1414_v2 = vadd.f32 %v3149_v21, %v1413_v1 }
 0xbc1   : > { %v2742_v28 = vpop.f32.mrf.mxu1 }
 0xbc2   : > { %1420 = vrot.lane.b32.xlu1 %v1414_v2, %s3000_s10  ;;  %1418 = vrot.lane.b32.xlu0 %v1414_v2, %s2999_s9  ;;  %s2525_s10 = sshll.u32 %s3059_s22, 7  ;;  %s3007_s22 = smov [#allocation2]  }
 0xbc3   : > { %s2938_s25 = sshll.u32 %s3007_s22, 4  ;;  %s2939_s25 = int_to_ptr.vmem [resolvable:$false] %s2938_s25 }
 0xbc4   : > { %s2940_s26 = scalar_lea.vmem %s2939_s25, 256 }
 0xbc6   : > { %1422 = vrot.lane.b32.xlu1 %v1414_v2, %s2998_s8  ;;  %1424 = vrot.lane.b32.xlu0 %v1414_v2, %s3001_s11  ;;  %s213_s8 = sand.u32 1, %s2986_s19  }
 0xbc7   : > { %s2476_s9 = sshll.u32 %s213_s8, 3 }
 0xc34   : > { %v3450_v16 = vpop.permute.xlu1 %1420  ;;  %v3452_v18 = vpop.permute.xlu0 %1418 }
 0xc35   : > { %1576 = vrot.lane.b32.xlu0 %v3450_v16, %s3001_s11  ;;  %1500 = vrot.lane.b32.xlu1 %v3452_v18, %s3001_s11 }
 0xc38   : > { %v3458_v21 = vpop.permute.xlu1 %1422  ;;  %v1425_v29 = vpop.permute.xlu0 %1424 }
 0xc39   : > { %1652 = vrot.lane.b32.xlu1 %v3458_v21, %s3001_s11  ;;  %2744 = vmatpush3.xpose.msk.msra.mxu1 %vm339_vm2, %v1425_v29  ;;  %s215_s11 = scalar_lea.vmem [#allocation2], %s2476_s9 }
 0xc3a   : > { %2748 = vmatprep.subr.mxu1 %v2996_v8 }
 0xc3c   : > { %2746 = vmatmul.mubr.msk.f32.vlgmr.msra.gmra.mxu1 %vm339_vm2, %v1414_v2 }
 0xc3d   : > { %2750 = vmatprep.mubr.msk.f32.mxu1 %vm2997_vm1, %v2996_v8 }
 0xca7   : > { %v1501_v30 = vpop.permute.xlu1 %1500  ;;  %v1577_v31 = vpop.permute.xlu0 %1576 }
 0xca8   : > { %2749 = vmatpush3.xpose.msk.msra.mxu1 %vm339_vm2, %v1501_v30 }
 0xca9   : > { %2753 = vmatprep.subr.mxu1 %v2996_v8 }
 0xcab   : > { %2751 = vmatmul.mubr.msk.f32.vlgmr.msra.gmra.mxu1 %vm339_vm2, %v3452_v18  ;;  %v1653_v32 = vpop.permute.xlu1 %1652 }
 0xcac   : > { %2754 = vmatpush3.xpose.msk.msra.mxu1 %vm339_vm2, %v1577_v31  ;;  %2755 = vmatprep.mubr.msk.f32.mxu1 %vm2997_vm1, %v2996_v8 }
 0xcad   : > { %2758 = vmatprep.subr.mxu1 %v2996_v8 }
 0xcaf   : > { %2756 = vmatmul.mubr.msk.f32.vlgmr.msra.gmra.mxu1 %vm339_vm2, %v3450_v16 }
 0xcb0   : > { %2759 = vmatpush3.xpose.msk.msra.mxu1 %vm339_vm2, %v1653_v32  ;;  %2760 = vmatprep.mubr.msk.f32.mxu1 %vm2997_vm1, %v2996_v8 }
 0xcb1   : > { %2763 = vmatprep.subr.mxu1 %v2996_v8 }
 0xcb3   : > { %2761 = vmatmul.mubr.msk.f32.vlgmr.msra.gmra.mxu1 %vm339_vm2, %v3458_v21 }
 0xcb4   : > { %2765 = vmatprep.mubr.msk.f32.mxu1 %vm2997_vm1, %v2996_v8 }
 0xcfc   : > { %v1496_v33 = vpop.f32.mrf.mxu1 }
 0xcfd   : > { %v1728_v34 = vsel %vm339_vm2, %v1496_v33, -inf }
 0xcfe   : > { %1729 = vmax.xlane.f32.xlu0 %v1728_v34  ;;  %v2747_v35 = vpop.f32.mrf.mxu1 }
 0xd6b   : > { %v1572_v36 = vpop.f32.mrf.mxu1 }
 0xd6c   : > { %v1731_v37 = vsel %vm339_vm2, %v1572_v36, -inf }
 0xd6d   : > { %1732 = vmax.xlane.f32.xlu1 %v1731_v37  ;;  %v2752_v38 = vpop.f32.mrf.mxu1 }
 0xd6f   : > { %v1648_v39 = vpop.f32.mrf.mxu1 }
 0xd70   : > { %v1734_v41 = vsel %vm339_vm2, %v1648_v39, -inf }
 0xd71   : > { %1735 = vmax.xlane.f32.xlu0 %v1734_v41  ;;  %v2757_v42 = vpop.f32.mrf.mxu1 }
 0xd73   : > { %v1724_v44 = vpop.f32.mrf.mxu1 }
 0xd74   : > { %v1737_v46 = vsel %vm339_vm2, %v1724_v44, -inf }
 0xd75   : > { %1738 = vmax.xlane.f32.xlu0 %v1737_v46  ;;  %v2762_v48 = vpop.f32.mrf.mxu1 }
 0xd7e   : > { %1772 = vrot.lane.b32.xlu1 %v1414_v2, %s3002_s12 }
 0xd87   : > { %v1730_v49 = vpop.xlane.xlu0 %1729 }
 0xd88   : > { %v1740_v50 = vsub.f32 %v1496_v33, %v1730_v49 }
 0xd8a   : > { %v1744_v51 = vmul.f32 1.442695, %v1740_v50 }
 0xd8c   : > { %2914 = vpow2.f32 %v1744_v51 }
 0xd99   : > { %v2915_v52 = vpop.eup %2914 }
 0xd9a   : > { %v1752_v53 = vsel %vm339_vm2, %v2915_v52, 0.0 }
 0xda2   : > { %1753 = vadd.xlane.f32.xlu1 %v1752_v53 }
 0xdf6   : > { %v1733_v57 = vpop.xlane.xlu1 %1732 }
 0xdf7   : > { %v1741_v58 = vsub.f32 %v1572_v36, %v1733_v57 }
 0xdf9   : > { %v1746_v59 = vmul.f32 1.442695, %v1741_v58 }
 0xdfa   : > { %v1773_v60 = vpop.permute.xlu1 %1772  ;;  %v1736_v47 = vpop.xlane.xlu0 %1735 }
 0xdfb   : > { %2916 = vpow2.f32 %v1746_v59  ;;  %v1742_v62 = vsub.f32 %v1648_v39, %v1736_v47  ;;  %2764 = vmatpush3.msra.mxu1 %v1773_v60 }
 0xdfc   : > { %2768 = vmatprep.subr.mxu1 %v2996_v8 }
 0xdfd   : > { %v1748_v1 = vmul.f32 1.442695, %v1742_v62 }
 0xdfe   : > { %v1739_v2 = vpop.xlane.xlu0 %1738 }
 0xdff   : > { %2918 = vpow2.f32 %v1748_v1  ;;  %v1743_v28 = vsub.f32 %v1724_v44, %v1739_v2 }
 0xe01   : > { %v1750_v29 = vmul.f32 1.442695, %v1743_v28 }
 0xe03   : > { %2920 = vpow2.f32 %v1750_v29 }
 0xe08   : > { %v2917_v30 = vpop.eup %2916 }
 0xe09   : > { %v1755_v31 = vsel %vm339_vm2, %v2917_v30, 0.0 }
 0xe0a   : > { %1756 = vadd.xlane.f32.xlu0 %v1755_v31 }
 0xe0c   : > { %v2919_v32 = vpop.eup %2918 }
 0xe0d   : > { %v1758_v33 = vsel %vm339_vm2, %v2919_v32, 0.0 }
 0xe0e   : > { %1759 = vadd.xlane.f32.xlu1 %v1758_v33 }
 0xe10   : > { %v2921_v34 = vpop.eup %2920 }
 0xe11   : > { %v1761_v35 = vsel %vm339_vm2, %v2921_v34, 0.0 }
 0xe12   : > { %1762 = vadd.xlane.f32.xlu0 %v1761_v35 }
 0xe1f   : > { %1924 = vrot.lane.b32.xlu1 %v3450_v16, %s3002_s12 }
 0xe23   : > { %2000 = vrot.lane.b32.xlu1 %v3458_v21, %s3002_s12 }
 0xe27   : > { %2108 = vrot.lane.b32.xlu1 %v3106_v9, %s3003_s13 }
 0xe28   : > { %1848 = vrot.lane.b32.xlu0 %v3452_v18, %s3002_s12  ;;  %s2413_s12 = sshll.u32 %s215_s11, 4  ;;  %s2414_s12 = int_to_ptr.vmem [resolvable:$true] %s2413_s12 }
 0xe29   : > { %s2934_s23 = scalar_lea.vmem %s2414_s12, 128  ;;  %p2941_p0 = scmp.lt.s32.totalorder %s2414_s12, %s2939_s25 }
 0xe2a   : > { %p2935_p11 = scmp.ne.s32.totalorder %s2414_s12, %s2934_s23  ;;  %p2942_p1 = scmp.lt.s32.totalorder %s2940_s26, %s2934_s23 }
 0xe2b   : > { %v1754_v36 = vpop.xlane.xlu1 %1753  ;;  %2106 = vrot.lane.b32.xlu1 %v3116_v10, %s3003_s13 }
 0xe2c   : > { %2922 = vrcp.f32 %v1754_v36  ;;  %2110 = vrot.lane.b32.xlu0 %v3100_v7, %s3003_s13  ;;  %p2936_p12 = pnand %p2935_p11, %p3076_p5  ;;  %p2943_p2 = por %p2942_p1, %p2941_p0 }
 0xe2e   : > { %p2937_p13 = pneg %p2936_p12 }
 0xe30   : > { %p2944_p3 = pnand %p2943_p2, %p2937_p13 }
 0xe39   : > { %v2923_v37 = vpop.eup %2922 }
 0xe3a   : > { %v1765_v38 = vmul.f32 %v2923_v37, %v2915_v52 }
 0xe3c   : > { %2766 = vmatmul.mubr.msk.f32.vlgmr.msra.gmra.mxu1 %vm339_vm2, %v1765_v38 }
 0xe3d   : > { %2770 = vmatprep.mubr.msk.f32.mxu1 %vm2997_vm1, %v2996_v8 }
 0xe93   : > { %v1757_v16 = vpop.xlane.xlu0 %1756 }
 0xe94   : > { %2924 = vrcp.f32 %v1757_v16 }
 0xe97   : > { %v1760_v9 = vpop.xlane.xlu1 %1759 }
 0xe98   : > { %2926 = vrcp.f32 %v1760_v9 }
 0xe9b   : > { %v1925_v18 = vpop.permute.xlu1 %1924  ;;  %v1763_v21 = vpop.xlane.xlu0 %1762 }
 0xe9c   : > { %2928 = vrcp.f32 %v1763_v21  ;;  %2774 = vmatpush3.msra.mxu0 %v1925_v18 }
 0xe9d   : > { %2783 = vmatprep.subr.mxu0 %v2996_v8 }
 0xe9f   : > { %v1849_v10 = vpop.permute.xlu0 %1848  ;;  %v2001_v41 = vpop.permute.xlu1 %2000 }
 0xea0   : > { %2769 = vmatpush3.msra.mxu1 %v1849_v10 }
 0xea1   : > { %v2925_v7 = vpop.eup %2924  ;;  %2778 = vmatprep.subr.mxu1 %v2996_v8 }
 0xea2   : > { %v1767_v39 = vmul.f32 %v2925_v7, %v2917_v30 }
 0xea3   : > { %v2111_v49 = vpop.permute.xlu0 %2110  ;;  %v2109_v50 = vpop.permute.xlu1 %2108 }
 0xea4   : > { %2771 = vmatmul.mubr.msk.f32.vlgmr.msra.gmra.mxu1 %vm339_vm2, %v1767_v39 }
 0xea5   : > { %v2927_v42 = vpop.eup %2926  ;;  %2779 = vmatpush3.msra.mxu1 %v2001_v41  ;;  %2780 = vmatprep.mubr.msk.f32.mxu1 %vm2997_vm1, %v2996_v8 }
 0xea6   : > { %v1769_v44 = vmul.f32 %v2927_v42, %v2919_v32  ;;  %2794 = vmatprep.subr.mxu1 %v2996_v8 }
 0xea7   : > { %v2107_v52 = vpop.permute.xlu1 %2106 }
 0xea8   : > { %2776 = vmatmul.mubr.msk.f32.vlgmr.msra.gmra.mxu0 %vm339_vm2, %v1769_v44 }
 0xea9   : > { %v2929_v46 = vpop.eup %2928  ;;  %2791 = vmatprep.mubr.msk.f32.mxu0 %vm2997_vm1, %v2996_v8  ;;  %2784 = vmatpush3.msra.mxu0 %v2111_v49 }
 0xeaa   : > { %v1771_v48 = vmul.f32 %v2929_v46, %v2921_v34  ;;  %2785 = vmatprep.subr.mxu0 %v2996_v8 }
 0xeab   : > { %2786 = vmatpush3.msra.mxu0 %v2109_v50 }
 0xeac   : > { %2781 = vmatmul.mubr.msk.f32.vlgmr.msra.gmra.mxu1 %vm339_vm2, %v1771_v48  ;;  %2787 = vmatprep.subr.mxu0 %v2996_v8 }
 0xead   : > { %2795 = vmatpush3.msra.mxu1 %v3259_v54  ;;  %2802 = vmatprep.mubr.msk.f32.mxu1 %vm2997_vm1, %v2996_v8 }
 0xeae   : > { %2796 = vmatprep.subr.mxu1 %v2996_v8  ;;  %2788 = vmatpush3.msra.mxu0 %v2107_v52 }
 0xeaf   : > { %2797 = vmatpush3.msra.mxu1 %v3265_v0  ;;  %2789 = vmatprep.subr.mxu0 %v2996_v8 }
 0xeb0   : > { %2798 = vmatprep.subr.mxu1 %v2996_v8 }
 0xeb1   : > { %2799 = vmatpush3.msra.mxu1 %v3271_v55 }
 0xeb2   : > { %2800 = vmatprep.subr.mxu1 %v2996_v8 }
 0xeb3   : > { %2801 = vmatpush3.msra.mxu1 %v3278_v56 }
 0xefc   : > { %v1844_v54 = vpop.f32.mrf.mxu1 }
 0xefe   : > { %v2767_v51 = vpop.f32.mrf.mxu1 }
 0xf64   : > { %v1920_v0 = vpop.f32.mrf.mxu1 }
 0xf65   : > { %2077 = vrot.lane.b32.xlu0 %v1920_v0, %s3004_s14 }
 0xf66   : > { %v2772_v55 = vpop.f32.mrf.mxu1 }
 0xf68   : > { %v1996_v53 = vpop.f32.mrf.mxu0 }
 0xf69   : > { %2081 = vrot.lane.b32.xlu0 %v1996_v53, %s3005_s15  ;;  %s2411_s15 = scalar_lea.hbm %s3624_s5, %s2525_s10 }
 0xf6a   : > { %v2777_v56 = vpop.f32.mrf.mxu0 }
 0xf6c   : > { %v2072_v57 = vpop.f32.mrf.mxu1 }
 0xf6d   : > { %2104 = vrot.lane.b32.xlu0 %v3125_v11, %s3003_s13  ;;  %2085 = vrot.lane.b32.xlu1 %v2072_v57, %s3006_s16  ;;  %s2400_s16 = scalar_lea.sflag [#allocation3], %s213_s8 }
 0xf6e   : > { %v2782_v58 = vpop.f32.mrf.mxu1 }
 0xfd7   : > { %v2078_v59 = vpop.permute.xlu0 %2077 }
 0xfd8   : > { %v2088_v47 = vsel %vm339_vm2, %v1844_v54, %v2078_v59 }
 0xfdb   : > { %v2082_v60 = vpop.permute.xlu0 %2081 }
 0xfdc   : > { %v2089_v62 = vsel %vm1003_vm3, %v2088_v47, %v2082_v60 }
 0xfdf   : > { %v2105_v1 = vpop.permute.xlu0 %2104  ;;  %v2086_v2 = vpop.permute.xlu1 %2085 }
 0xfe0   : > { %v2090_v28 = vsel %vm1005_vm4, %v2089_v62, %v2086_v2  ;;  %2790 = vmatpush3.msra.mxu0 %v2105_v1 }
 0xfe1   : > { %2792 = vmatmul.mubr.msk.f32.vlgmr.msra.gmra.mxu0 %vm223_vm0, %v2090_v28  ;;  %2805 = vmatprep.subr.mxu0 %v2996_v8 }
 0xfe2   : > { %2806 = vmatpush3.msra.mxu0 %v3310_v3  ;;  %2837 = vmatprep.mubr.msk.f32.mxu0 %vm2997_vm1, %v2996_v8 }
 0xfe3   : > { %2807 = vmatprep.subr.mxu0 %v2996_v8 }
 0xfe4   : > { %2808 = vmatpush3.msra.mxu0 %v3317_v4 }
 0xfe5   : > { %2809 = vmatprep.subr.mxu0 %v2996_v8 }
 0xfe6   : > { %2810 = vmatpush3.msra.mxu0 %v3324_v5 }
 0xfe7   : > { %2811 = vmatprep.subr.mxu0 %v2996_v8 }
 0xfe8   : > { %2812 = vmatpush3.msra.mxu0 %v3331_v6 }
 0xfe9   : > { %2813 = vmatprep.subr.mxu0 %v2996_v8 }
 0xfea   : > { %2814 = vmatpush3.msra.mxu0 %v3338_v12 }
 0xfeb   : > { %2815 = vmatprep.subr.mxu0 %v2996_v8 }
 0xfec   : > { %2816 = vmatpush3.msra.mxu0 %v3344_v13 }
 0xfed   : > { %2817 = vmatprep.subr.mxu0 %v2996_v8 }
 0xfee   : > { %2818 = vmatpush3.msra.mxu0 %v3350_v14 }
 0xfef   : > { %2819 = vmatprep.subr.mxu0 %v2996_v8 }
 0xff0   : > { %2820 = vmatpush3.msra.mxu0 %v3357_v15 }
 0xff1   : > { %2821 = vmatprep.subr.mxu0 %v2996_v8 }
 0xff2   : > { %2822 = vmatpush3.msra.mxu0 %v3364_v17 }
 0xff3   : > { %2823 = vmatprep.subr.mxu0 %v2996_v8 }
 0xff4   : > { %2824 = vmatpush3.msra.mxu0 %v3371_v19 }
 0xff5   : > { %2825 = vmatprep.subr.mxu0 %v2996_v8 }
 0xff6   : > { %2826 = vmatpush3.msra.mxu0 %v3378_v20 }
 0xff7   : > { %2827 = vmatprep.subr.mxu0 %v2996_v8 }
 0xff8   : > { %2828 = vmatpush3.msra.mxu0 %v3385_v22 }
 0xff9   : > { %2829 = vmatprep.subr.mxu0 %v2996_v8 }
 0xffa   : > { %2830 = vmatpush3.msra.mxu0 %v3392_v23 }
 0xffb   : > { %2831 = vmatprep.subr.mxu0 %v2996_v8 }
 0xffc   : > { %2832 = vmatpush3.msra.mxu0 %v3399_v24 }
 0xffd   : > { %2833 = vmatprep.subr.mxu0 %v2996_v8 }
 0xffe   : > { %2834 = vmatpush3.msra.mxu0 %v3406_v25 }
 0xfff   : > { %2835 = vmatprep.subr.mxu0 %v2996_v8 }
0x1000   : > { %2836 = vmatpush3.msra.mxu0 %v3413_v26 }
0x10a1   : > { %v2185_v11 = vpop.f32.mrf.mxu0 }
0x10a2   : > { %v2186_v3 = vadd.f32 %v3246_v43, %v2185_v11 }
0x10a3   : > { %v2793_v4 = vpop.f32.mrf.mxu0 }
0x10a4   : > { %v2189_v5 = vadd.f32 %v2186_v3, %v3434_v45 }
0x10a6   : > { %v2192_v6 = vsel %vm223_vm0, %v2189_v5, 0.0 }
0x10a7   : > { %2193 = vadd.xlane.f32.xlu1 %v2192_v6 }
0x1130   : > { %v2194_v12 = vpop.xlane.xlu1 %2193 }
0x1131   : > { %v2195_v13 = vmul.f32 0.03125, %v2194_v12 }
0x1133   : > { %v2196_v14 = vsub.f32 %v2189_v5, %v2195_v13 }
0x1135   : > { %v2197_v15 = vmul.f32 %v2196_v14, %v2196_v14 }
0x1137   : > { %v2198_v17 = vsel %vm223_vm0, %v2197_v15, 0.0 }
0x1138   : > { %2199 = vadd.xlane.f32.xlu0 %v2198_v17 }
0x11c1   : > { %v2200_v19 = vpop.xlane.xlu0 %2199 }
0x11c2   : > { %v2201_v8 = vmul.f32 0.03125, %v2200_v19 }
0x11c4   : > { %v2202_v20 = vadd.f32 1e-05, %v2201_v8 }
0x11c6   : > { %2930 = vrsqrt.f32 %v2202_v20 }
0x11d3   : > { %v2931_v22 = vpop.eup %2930 }
0x11d4   : > { %v2204_v23 = vmul.f32 %v2931_v22, %v2196_v14 }
0x11d6   : > { %v2209_v43 = vmul.f32 %v3287_v61, %v2204_v23 }
0x11d8   : > { %v2214_v24 = vadd.f32 %v3292_v63, %v2209_v43 }
0x11da   : > { %2803 = vmatmul.mubr.msk.f32.vlgmr.msra.gmra.mxu1 %vm223_vm0, %v2214_v24 }
0x129a   : > { %v2293_v25 = vpop.f32.mrf.mxu1 }
0x129b   : > { %v2294_v26 = vadd.f32 %v3422_v27, %v2293_v25 }
0x129c   : > { %v2804_v45 = vpop.f32.mrf.mxu1 }
0x129d   : > { %v2298_v29 = vmul.f32 0.044715, %v2294_v26  ;;  %v2297_v35 = vmul.f32 0.5, %v2294_v26 }
0x129f   : > { %v2299_v30 = vmul.f32 %v2298_v29, %v2294_v26 }
0x12a1   : > { %v2300_v31 = vmul.f32 %v2299_v30, %v2294_v26 }
0x12a3   : > { %v2301_v32 = vadd.f32 %v2300_v31, %v2294_v26 }
0x12a5   : > { %v2302_v33 = vmul.f32 0.7978846, %v2301_v32 }
0x12a7   : > { %2932 = vtanh.f32 %v2302_v33 }
0x12b4   : > { %v2933_v34 = vpop.eup %2932 }
0x12b5   : > { %v2304_v36 = vadd.f32 1.0, %v2933_v34 }
0x12b7   : > { %v2305_v61 = vmul.f32 %v2304_v36, %v2297_v35 }
0x12b9   : > { %2838 = vmatmul.mubr.f32.vlgmr.msra.gmra.mxu0 %v2305_v61 }
0x1379   : > { %v2393_v63 = vpop.f32.mrf.mxu0 }
0x137a   : > { %v2394_v27 = vadd.f32 %v3430_v40, %v2393_v63 }
0x137b   : > { %v2839_v37 = vpop.f32.mrf.mxu0 }
0x137c   : > { %v2397_v38 = vadd.f32 %v2394_v27, %v2189_v5 }
0x137e   : > { %2398 = vst.msk [vmem:[%s215_s11] sm:$0xff] %vm223_vm0, %v2397_v38 }
0x137f   : > { %2947 = shalt.err (!%p2944_p3)
}
0x1380   : > { %s2948_s30 = scalar_lea.hbm %s2411_s15, 128  ;;  %s2952_s17 = scalar_lea.hbm %s3624_s5, 256 }
0x1381   : > { %p2949_p4 = scmp.ne.s32.totalorder %s2411_s15, %s2948_s30  ;;  %p2953_p9 = scmp.lt.s32.totalorder %s2411_s15, %s3624_s5 }
0x1382   : > { %p2954_p10 = scmp.lt.s32.totalorder %s2952_s17, %s2948_s30 }
0x1383   : > { %p2950_p7 = pnand %p2949_p4, %p3076_p5 }
0x1384   : > { %p2955_p11 = por %p2954_p10, %p2953_p9 }
0x1385   : > { %p2951_p8 = pneg %p2950_p7 }
0x1387   : > { %p2956_p12 = pnand %p2955_p11, %p2951_p8 }
0x1389   : > { %2959 = shalt.err (!%p2956_p12)
}
0x138a   : > { %2840 = dma.vmem_to_hbm [thread:$0]  (%p3076_p5), %s2414_s12, 128, %s2411_s15, %s2400_s16  }
0x138b PF: > { %p2846_p13 = scmp.ge.s32.totalorder %s2994_s21, 2  ;;  %s2425_s10 = sand.u32 1, %s2982_s18  }
0x138c   : > { %s2426_s11 = scalar_lea.sflag [#allocation3], %s2425_s10 }
0x138d   : > { %p2843_p0 = pnand %p2846_p13, %p3080_p6 }
0x138f   : > { %p2844_p1 = pneg %p2843_p0 }
0x1391   : > { %2977 = dma.done.wait (%p2844_p1), %s2426_s11, 128  }
0x1392   : > { %2979 = vsyncadd (%p2844_p1), %s2426_s11, 4294967168  ;;  %p15_p2 = scmp.ge.s32.totalorder %s3063_s24, 4   ;;  %s3627_s18 = smov %s2986_s19 }
0x1393   : > { %s3628_s19 = smov %s2990_s20  ;;  %s3629_s20 = smov %s3074_s27 }
0x1394   : > { %s3630_s21 = smov %s3063_s24  ;;  %17 = sbr.rel (!%p15_p2) target bundleno = 3 (0x3), region = 75 }
0x1399   :  { %2431 = vsyncpa [#allocation3], 1 }
0x139a   :  { %2433 = vsyncpa [#allocation3 + $0x1], 1 }

</bundles_post_ra>
